<compile_context>
chip_gen: v6e
topology: v6e:2x2x1
jax: 0.10.0
libtpu: 0.0.40
codegen_flags: <defaults>
</compile_context>

<pallas_src>
import functools

import jax
import jax.numpy as jnp
from jax.experimental import pallas as pl
from jax.experimental.pallas import tpu as pltpu

BN_EPS = 1e-5


# ---------------------------------------------------------------------------
# Pallas kernels
# ---------------------------------------------------------------------------
def _mm_kernel(act, x_ref, w_ref, s_ref, b_ref, o_ref, acc_ref):
    """One (tm, tn) output tile; grid axis 2 is the K reduction."""

    @pl.when(pl.program_id(2) == 0)
    def _init():
        acc_ref[...] = jnp.zeros_like(acc_ref)

    acc_ref[...] += jnp.dot(x_ref[...], w_ref[...],
                            preferred_element_type=jnp.float32)

    @pl.when(pl.program_id(2) == pl.num_programs(2) - 1)
    def _finalize():
        y = acc_ref[...] * s_ref[...] + b_ref[...]
        if act == "relu":
            y = jnp.maximum(y, 0.0)
        elif act == "sigmoid":
            y = jax.nn.sigmoid(y)
        elif act == "tanh":
            y = jnp.tanh(y)
        o_ref[...] = y.astype(o_ref.dtype)


def _pick_tile(dim, candidates):
    for c in candidates:
        if dim >= c and dim % c == 0:
            return c
    return dim


def pallas_matmul(x, w, scale, shift, act="none"):
    """y = act((x @ w) * scale + shift).  x/w hit the MXU in bf16, epilogue f32."""
    M, K = x.shape
    _, N = w.shape
    xb = x.astype(jnp.bfloat16)
    wb = w.astype(jnp.bfloat16)
    scale = scale.reshape(1, N).astype(jnp.float32)
    shift = shift.reshape(1, N).astype(jnp.float32)

    # ---- tile selection ----------------------------------------------------
    tm = _pick_tile(M, (512, 256, 128, 64, 32, 16, 8))
    if N <= 512:
        tn = N                                   # full width (== full dim is legal)
    else:
        tn = _pick_tile(N, (512, 256, 128))
    tk = K
    if K > 2560:                                 # split big K so DMA overlaps MXU
        for cand in (2304, 2048, 1792, 1536, 1280, 1152, 1024, 896, 768, 640, 512):
            if cand % 128 == 0 and K % cand == 0:
                tk = cand
                break
    # Tiny 8x8-resolution layers: expose >=2 blocks along a parallel axis so a
    # v7x chip (2 TensorCores) does not serialize on a (1,1) grid.
    if M // tm == 1 and N // tn == 1 and tm % 16 == 0:
        tm //= 2

    nm, nn, nk = M // tm, N // tn, K // tk

    # ---- VMEM budget: double-buffered blocks + accumulator, capped <=48 MiB -
    vmem_need = (2 * (tm * tk + tk * tn) * 2     # bf16 x / w blocks, 2 buffers
                 + 2 * tm * tn * 4               # f32 output blocks, 2 buffers
                 + tm * tn * 4                   # f32 accumulator scratch
                 + 2 * 2 * tn * 4)               # scale / shift blocks
    vmem_limit = int(min(max(2 * vmem_need, 24 << 20), 48 << 20))

    kernel = functools.partial(_mm_kernel, act)
    return pl.pallas_call(
        kernel,
        out_shape=jax.ShapeDtypeStruct((M, N), jnp.float32),
        grid=(nm, nn, nk),
        in_specs=[
            pl.BlockSpec((tm, tk), lambda i, j, k: (i, k)),
            pl.BlockSpec((tk, tn), lambda i, j, k: (k, j)),
            pl.BlockSpec((1, tn), lambda i, j, k: (0, j)),
            pl.BlockSpec((1, tn), lambda i, j, k: (0, j)),
        ],
        out_specs=pl.BlockSpec((tm, tn), lambda i, j, k: (i, j)),
        scratch_shapes=[pltpu.VMEM((tm, tn), jnp.float32)],
        compiler_params=pltpu.CompilerParams(
            dimension_semantics=("parallel", "parallel", "arbitrary"),
            vmem_limit_bytes=vmem_limit,
        ),
    )(xb, wb, scale, shift)


def _ca_kernel(x_ref, w1_ref, b1_ref, w2_ref, b2_ref, o_ref):
    """Fused squeeze-and-excitation: GAP -> fc1+ReLU -> fc2+sigmoid -> rescale."""
    x = x_ref[...]                                          # (N, HW, C)
    pooled = jnp.mean(x, axis=1)                            # (N, C)
    h = jnp.dot(pooled, w1_ref[...], preferred_element_type=jnp.float32) + b1_ref[...]
    h = jnp.maximum(h, 0.0)
    att = jnp.dot(h, w2_ref[...], preferred_element_type=jnp.float32) + b2_ref[...]
    att = jax.nn.sigmoid(att)
    o_ref[...] = x * att[:, None, :]


def channel_attention(x_nhwc, fc1, fc2):
    N, H, W, C = x_nhwc.shape
    (w1, b1), (w2, b2) = fc1, fc2                  # [C16,C,1,1], [C,C16,1,1]
    C16 = w1.shape[0]
    w1m = jnp.transpose(w1[:, :, 0, 0]).astype(jnp.float32)   # [C, C16]
    w2m = jnp.transpose(w2[:, :, 0, 0]).astype(jnp.float32)   # [C16, C]
    x_flat = x_nhwc.reshape(N, H * W, C)
    out = pl.pallas_call(
        _ca_kernel,
        out_shape=jax.ShapeDtypeStruct((N, H * W, C), jnp.float32),
        grid=(1,),
        in_specs=[
            pl.BlockSpec((N, H * W, C), lambda i: (0, 0, 0)),
            pl.BlockSpec((C, C16), lambda i: (0, 0)),
            pl.BlockSpec((1, C16), lambda i: (0, 0)),
            pl.BlockSpec((C16, C), lambda i: (0, 0)),
            pl.BlockSpec((1, C), lambda i: (0, 0)),
        ],
        out_specs=pl.BlockSpec((N, H * W, C), lambda i: (0, 0, 0)),
        compiler_params=pltpu.CompilerParams(
            dimension_semantics=("arbitrary",)),
    )(x_flat, w1m, b1.reshape(1, C16), w2m, b2.reshape(1, C))
    return out.reshape(N, H, W, C)


# ---------------------------------------------------------------------------
# Conv building blocks (im2col glue in JAX, matmul in Pallas)
# ---------------------------------------------------------------------------
def fold_bn(bias, bn):
    # TODO(synk): BatchNorm is applied in inference mode (running stats
    # mean=0, var=1, gamma=1, beta=0); PyTorch default .train() mode would use
    # batch statistics instead.
    if bn is None:
        return jnp.ones_like(bias), bias
    gamma, beta, mean, var = bn
    s = gamma / jnp.sqrt(var + BN_EPS)
    return s, (bias - mean) * s + beta


def im2col(x, k, pad):
    # TODO(synk): for the 32x32 / 64x64 layers the k*k patch materialization is
    # the remaining HBM hot spot; moving the taps into the Pallas kernel (halo
    # tile + k*k accumulated dots) needs element-granular index maps / manual
    # DMA, so patches are kept (in bf16) for robustness.
    N, H, W, C = x.shape
    xp = jnp.pad(x, ((0, 0), (pad, pad), (pad, pad), (0, 0)))
    Ho = H + 2 * pad - k + 1
    Wo = W + 2 * pad - k + 1
    cols = [xp[:, dy:dy + Ho, dx:dx + Wo, :] for dy in range(k) for dx in range(k)]
    patches = jnp.concatenate(cols, axis=-1)            # [N, Ho, Wo, k*k*C]
    return patches.reshape(N * Ho * Wo, k * k * C), (N, Ho, Wo)


def conv2d(x, w_oihw, bias, k, pad, act="none", bn=None, pad_cout_to=None):
    """x: NHWC, w_oihw: PyTorch Conv2d weight layout [Cout, Cin, k, k]."""
    Cout = w_oihw.shape[0]
    w_hwio = jnp.transpose(w_oihw, (2, 3, 1, 0))        # -> [k, k, Cin, Cout]
    wmat = w_hwio.reshape(-1, Cout)
    scale, shift = fold_bn(bias, bn)
    if pad_cout_to is not None and pad_cout_to > Cout:  # lane-dense output pad
        extra = pad_cout_to - Cout
        wmat = jnp.pad(wmat, ((0, 0), (0, extra)))
        scale = jnp.pad(scale, (0, extra), constant_values=1.0)
        shift = jnp.pad(shift, (0, extra))
    cols, (N, Ho, Wo) = im2col(x.astype(jnp.bfloat16), k, pad)
    y = pallas_matmul(cols, wmat, scale, shift, act)
    if pad_cout_to is not None and pad_cout_to > Cout:
        y = y[:, :Cout]
    return y.reshape(N, Ho, Wo, Cout)


def _convt_phase_weights(w_iohw):
    """[9*Cin, 4*Cout] matrix implementing ConvTranspose2d(k=4, s=2, p=1) as a
    3x3-tap matmul whose 4 output-column groups are the (ry, rx) parity phases.

    out[2p+ry, 2q+rx, co] = sum_{dy,dx,ci} x_pad[p+dy-1, q+dx-1, ci]
                            * w[ci, co, 3+ry-2*dy, 3+rx-2*dx]
    (tap is zero unless dy-ry in {0,1} and dx-rx in {0,1}).
    """
    Cin, Cout = w_iohw.shape[0], w_iohw.shape[1]
    tap_blocks = []
    for dy in range(3):
        for dx in range(3):
            phase_cols = []
            for ry in range(2):
                for rx in range(2):
                    ky = 3 + ry - 2 * dy
                    kx = 3 + rx - 2 * dx
                    if (dy - ry) in (0, 1) and (dx - rx) in (0, 1) \
                            and 0 <= ky <= 3 and 0 <= kx <= 3:
                        phase_cols.append(w_iohw[:, :, ky, kx])
                    else:
                        phase_cols.append(jnp.zeros((Cin, Cout), w_iohw.dtype))
            tap_blocks.append(jnp.concatenate(phase_cols, axis=1))   # [Cin, 4*Cout]
    return jnp.concatenate(tap_blocks, axis=0)                       # [9*Cin, 4*Cout]


def conv_transpose2d(x, w_iohw, bias, act="none", bn=None):
    """PyTorch ConvTranspose2d(k=4, stride=2, padding=1) via 2x2 sub-pixel phase
    decomposition — no zero-dilated input, ~4x fewer im2col rows."""
    N, H, W, Cin = x.shape
    Cout = w_iohw.shape[1]
    wmat = _convt_phase_weights(w_iohw)                 # [9*Cin, 4*Cout]
    scale, shift = fold_bn(bias, bn)
    scale4 = jnp.tile(scale, 4)
    shift4 = jnp.tile(shift, 4)
    cols, _ = im2col(x.astype(jnp.bfloat16), 3, 1)      # [N*H*W, 9*Cin]
    y = pallas_matmul(cols, wmat, scale4, shift4, act)  # [N*H*W, 4*Cout]
    y = y.reshape(N, H, W, 2, 2, Cout)                  # (n, p, q, ry, rx, co)
    y = jnp.transpose(y, (0, 1, 3, 2, 4, 5)).reshape(N, 2 * H, 2 * W, Cout)
    return y


# ---------------------------------------------------------------------------
# Parameters (deterministic synthetic init, PyTorch layouts)
# ---------------------------------------------------------------------------
def init_params(key, sc=256, tc=256):
    keys = iter(jax.random.split(key, 80))

    def conv_p(cout, cin, k):
        fan_in = cin * k * k
        w = jax.random.normal(next(keys), (cout, cin, k, k), jnp.float32) / jnp.sqrt(fan_in)
        b = jax.random.normal(next(keys), (cout,), jnp.float32) * 0.01
        return w, b

    def convt_p(cin, cout, k):
        fan_in = cin * k * k
        w = jax.random.normal(next(keys), (cin, cout, k, k), jnp.float32) / jnp.sqrt(fan_in)
        b = jax.random.normal(next(keys), (cout,), jnp.float32) * 0.01
        return w, b

    def bn_p(c):  # (gamma, beta, running_mean, running_var)
        return (jnp.ones((c,), jnp.float32), jnp.zeros((c,), jnp.float32),
                jnp.zeros((c,), jnp.float32), jnp.ones((c,), jnp.float32))

    p = {}
    p["spatial_ca_fc1"] = conv_p(sc // 16, sc, 1)
    p["spatial_ca_fc2"] = conv_p(sc, sc // 16, 1)
    p["temporal_ca_fc1"] = conv_p(tc // 16, tc, 1)
    p["temporal_ca_fc2"] = conv_p(tc, tc // 16, 1)
    p["spatial_conv1"] = conv_p(128, sc, 1)
    p["spatial_conv3"] = conv_p(128, sc, 3)
    p["spatial_conv5"] = conv_p(128, sc, 5)
    p["temporal_conv1"] = conv_p(128, tc, 1)
    p["temporal_conv3"] = conv_p(128, tc, 3)
    p["temporal_conv5"] = conv_p(128, tc, 5)
    p["f1_conv"] = conv_p(384, 768, 3);  p["f1_bn1"] = bn_p(384)
    p["f1_convt"] = convt_p(384, 384, 4); p["f1_bn2"] = bn_p(384)
    p["f2_conv"] = conv_p(192, 384, 3);  p["f2_bn1"] = bn_p(192)
    p["f2_convt"] = convt_p(192, 192, 4); p["f2_bn2"] = bn_p(192)
    p["f3_conv"] = conv_p(96, 192, 3);   p["f3_bn1"] = bn_p(96)
    p["f3_convt"] = convt_p(96, 96, 4);  p["f3_bn2"] = bn_p(96)
    p["final_conv1"] = conv_p(64, 96, 3); p["final_bn"] = bn_p(64)
    p["final_conv2"] = conv_p(3, 64, 3)
    return p


# ---------------------------------------------------------------------------
# Forward pass (mirrors FeatureFusion.forward)
# ---------------------------------------------------------------------------
def feature_fusion_forward(params, spatial_nchw, temporal_nchw):
    s = jnp.transpose(spatial_nchw, (0, 2, 3, 1)).astype(jnp.float32)   # NCHW -> NHWC
    t = jnp.transpose(temporal_nchw, (0, 2, 3, 1)).astype(jnp.float32)

    s = channel_attention(s, params["spatial_ca_fc1"], params["spatial_ca_fc2"])
    t = channel_attention(t, params["temporal_ca_fc1"], params["temporal_ca_fc2"])

    s1 = conv2d(s, *params["spatial_conv1"], k=1, pad=0)
    s3 = conv2d(s, *params["spatial_conv3"], k=3, pad=1)
    s5 = conv2d(s, *params["spatial_conv5"], k=5, pad=2)
    t1 = conv2d(t, *params["temporal_conv1"], k=1, pad=0)
    t3 = conv2d(t, *params["temporal_conv3"], k=3, pad=1)
    t5 = conv2d(t, *params["temporal_conv5"], k=5, pad=2)
    fused = jnp.concatenate([s1, s3, s5, t1, t3, t5], axis=-1)          # [N, H, W, 768]

    x = conv2d(fused, *params["f1_conv"], k=3, pad=1, act="relu", bn=params["f1_bn1"])
    x = conv_transpose2d(x, *params["f1_convt"], act="relu", bn=params["f1_bn2"])
    x = conv2d(x, *params["f2_conv"], k=3, pad=1, act="relu", bn=params["f2_bn1"])
    x = conv_transpose2d(x, *params["f2_convt"], act="relu", bn=params["f2_bn2"])
    x = conv2d(x, *params["f3_conv"], k=3, pad=1, act="relu", bn=params["f3_bn1"])
    x = conv_transpose2d(x, *params["f3_convt"], act="relu", bn=params["f3_bn2"])
    x = conv2d(x, *params["final_conv1"], k=3, pad=1, act="relu", bn=params["final_bn"])
    out = conv2d(x, *params["final_conv2"], k=3, pad=1, act="tanh",
                 pad_cout_to=128)                                        # lane-dense store
    return jnp.transpose(out, (0, 3, 1, 2))                              # back to NCHW


if __name__ == "__main__":
    key = jax.random.PRNGKey(0)
    kp, ks, kt = jax.random.split(key, 3)
    params = init_params(kp)
    spatial_features = jax.random.normal(ks, (2, 256, 8, 8), jnp.float32)
    temporal_features = jax.random.normal(kt, (2, 256, 8, 8), jnp.float32)

    out = jax.jit(feature_fusion_forward)(params, spatial_features, temporal_features)
    out = jax.block_until_ready(out)
    assert out.shape == (2, 3, 64, 64), out.shape
    assert jnp.all(jnp.isfinite(out))
    print("KERNEL_OK")
</pallas_src>

<mosaic_0001>
module attributes {stable_mosaic.version = 11 : i64} {
  func.func @_ca_kernel(%arg0: i32, %arg1: memref<2x64x256xf32, #tpu.memory_space<vmem>>, %arg2: memref<256x16xf32, #tpu.memory_space<vmem>>, %arg3: memref<1x16xf32, #tpu.memory_space<vmem>>, %arg4: memref<16x256xf32, #tpu.memory_space<vmem>>, %arg5: memref<1x256xf32, #tpu.memory_space<vmem>>, %arg6: memref<2x64x256xf32, #tpu.memory_space<vmem>>) attributes {dimension_semantics = [#tpu.dimension_semantics<arbitrary>], iteration_bounds = array<i64: 1>, scalar_prefetch = 0 : i64, scratch_operands = 0 : i64, tpu.core_type = #tpu.core_type<tc>, window_params = [{pipeline_mode = #tpu.pipeline_mode<synchronous>, transform_indices = @transform_0, window_bounds = array<i64: 2, 64, 256>}, {pipeline_mode = #tpu.pipeline_mode<synchronous>, transform_indices = @transform_1, window_bounds = array<i64: 256, 16>}, {pipeline_mode = #tpu.pipeline_mode<synchronous>, transform_indices = @transform_2, window_bounds = array<i64: 1, 16>}, {pipeline_mode = #tpu.pipeline_mode<synchronous>, transform_indices = @transform_3, window_bounds = array<i64: 16, 256>}, {pipeline_mode = #tpu.pipeline_mode<synchronous>, transform_indices = @transform_4, window_bounds = array<i64: 1, 256>}, {pipeline_mode = #tpu.pipeline_mode<synchronous>, transform_indices = @transform_5, window_bounds = array<i64: 2, 64, 256>}]} {
    %c0 = arith.constant 0 : index
    %c0_0 = arith.constant 0 : index
    %c0_1 = arith.constant 0 : index
    %0 = vector.load %arg1[%c0, %c0_0, %c0_1] : memref<2x64x256xf32, #tpu.memory_space<vmem>>, vector<2x64x256xf32>
    %cst = arith.constant dense<0.000000e+00> : vector<2x256xf32>
    %1 = vector.multi_reduction <add>, %0, %cst [1] : vector<2x64x256xf32> to vector<2x256xf32>
    %cst_2 = arith.constant 6.400000e+01 : f32
    %2 = vector.broadcast %cst_2 : f32 to vector<2x256xf32>
    %3 = arith.divf %1, %2 : vector<2x256xf32>
    %c0_3 = arith.constant 0 : index
    %c0_4 = arith.constant 0 : index
    %4 = vector.load %arg2[%c0_3, %c0_4] : memref<256x16xf32, #tpu.memory_space<vmem>>, vector<256x16xf32>
    %cst_5 = arith.constant dense<0.000000e+00> : vector<2x16xf32>
    %5 = tpu.matmul %3, %4, %cst_5 {dimension_numbers = #tpu.dot_dimension_numbers<[1], [0], [0], [1], [0, 0, 1, 1], [], []>} : vector<2x256xf32>, vector<256x16xf32>, vector<2x16xf32> -> vector<2x16xf32>
    %c0_6 = arith.constant 0 : index
    %c0_7 = arith.constant 0 : index
    %6 = vector.load %arg3[%c0_6, %c0_7] : memref<1x16xf32, #tpu.memory_space<vmem>>, vector<1x16xf32>
    %7 = vector.broadcast %6 : vector<1x16xf32> to vector<2x16xf32>
    %8 = arith.addf %5, %7 : vector<2x16xf32>
    %cst_8 = arith.constant 0.000000e+00 : f32
    %9 = vector.broadcast %cst_8 : f32 to vector<2x16xf32>
    %10 = arith.maximumf %8, %9 : vector<2x16xf32>
    %c0_9 = arith.constant 0 : index
    %c0_10 = arith.constant 0 : index
    %11 = vector.load %arg4[%c0_9, %c0_10] : memref<16x256xf32, #tpu.memory_space<vmem>>, vector<16x256xf32>
    %cst_11 = arith.constant dense<0.000000e+00> : vector<2x256xf32>
    %12 = tpu.matmul %10, %11, %cst_11 {dimension_numbers = #tpu.dot_dimension_numbers<[1], [0], [0], [1], [0, 0, 1, 1], [], []>} : vector<2x16xf32>, vector<16x256xf32>, vector<2x256xf32> -> vector<2x256xf32>
    %c0_12 = arith.constant 0 : index
    %c0_13 = arith.constant 0 : index
    %13 = vector.load %arg5[%c0_12, %c0_13] : memref<1x256xf32, #tpu.memory_space<vmem>>, vector<1x256xf32>
    %14 = vector.broadcast %13 : vector<1x256xf32> to vector<2x256xf32>
    %15 = arith.addf %12, %14 : vector<2x256xf32>
    %16 = arith.negf %15 : vector<2x256xf32>
    %17 = math.exp %16 : vector<2x256xf32>
    %cst_14 = arith.constant 1.000000e+00 : f32
    %18 = vector.broadcast %cst_14 : f32 to vector<2x256xf32>
    %19 = arith.addf %18, %17 : vector<2x256xf32>
    %20 = arith.divf %18, %19 : vector<2x256xf32>
    %21 = vector.shape_cast %20 : vector<2x256xf32> to vector<2x1x256xf32>
    %22 = vector.broadcast %21 : vector<2x1x256xf32> to vector<2x64x256xf32>
    %23 = arith.mulf %0, %22 : vector<2x64x256xf32>
    %c0_15 = arith.constant 0 : index
    %c0_16 = arith.constant 0 : index
    %c0_17 = arith.constant 0 : index
    %24 = vector.load %arg6[%c0_15, %c0_16, %c0_17] : memref<2x64x256xf32, #tpu.memory_space<vmem>>, vector<2x64x256xf32>
    tpu.vector_store %arg6[%c0_15, %c0_16, %c0_17], %23 {strides = array<i32>} : memref<2x64x256xf32, #tpu.memory_space<vmem>>, vector<2x64x256xf32>,
    return
  }
  func.func @transform_0(%arg0: i32) -> (i32, i32, i32) {
    %c0_i32 = arith.constant 0 : i32
    %c0_i32_0 = arith.constant 0 : i32
    %c0_i32_1 = arith.constant 0 : i32
    %c0_i32_2 = arith.constant 0 : i32
    return %c0_i32, %c0_i32_0, %c0_i32_1 : i32, i32, i32
  }
  func.func @transform_1(%arg0: i32) -> (i32, i32) {
    %c0_i32 = arith.constant 0 : i32
    %c0_i32_0 = arith.constant 0 : i32
    %c0_i32_1 = arith.constant 0 : i32
    return %c0_i32, %c0_i32_0 : i32, i32
  }
  func.func @transform_2(%arg0: i32) -> (i32, i32) {
    %c0_i32 = arith.constant 0 : i32
    %c0_i32_0 = arith.constant 0 : i32
    %c0_i32_1 = arith.constant 0 : i32
    return %c0_i32, %c0_i32_0 : i32, i32
  }
  func.func @transform_3(%arg0: i32) -> (i32, i32) {
    %c0_i32 = arith.constant 0 : i32
    %c0_i32_0 = arith.constant 0 : i32
    %c0_i32_1 = arith.constant 0 : i32
    return %c0_i32, %c0_i32_0 : i32, i32
  }
  func.func @transform_4(%arg0: i32) -> (i32, i32) {
    %c0_i32 = arith.constant 0 : i32
    %c0_i32_0 = arith.constant 0 : i32
    %c0_i32_1 = arith.constant 0 : i32
    return %c0_i32, %c0_i32_0 : i32, i32
  }
  func.func @transform_5(%arg0: i32) -> (i32, i32, i32) {
    %c0_i32 = arith.constant 0 : i32
    %c0_i32_0 = arith.constant 0 : i32
    %c0_i32_1 = arith.constant 0 : i32
    %c0_i32_2 = arith.constant 0 : i32
    return %c0_i32, %c0_i32_0, %c0_i32_1 : i32, i32, i32
  }
}

module attributes {stable_mosaic.version = 11 : i64} {
  func.func @_mm_kernel(%arg0: i32, %arg1: i32, %arg2: i32, %arg3: memref<64x2304xbf16, #tpu.memory_space<vmem>>, %arg4: memref<2304x128xbf16, #tpu.memory_space<vmem>>, %arg5: memref<1x128xf32, #tpu.memory_space<vmem>>, %arg6: memref<1x128xf32, #tpu.memory_space<vmem>>, %arg7: memref<64x128xf32, #tpu.memory_space<vmem>>, %arg8: memref<64x128xf32, #tpu.memory_space<vmem>>) attributes {dimension_semantics = [#tpu.dimension_semantics<parallel>, #tpu.dimension_semantics<parallel>, #tpu.dimension_semantics<arbitrary>], iteration_bounds = array<i64: 2, 1, 1>, scalar_prefetch = 0 : i64, scratch_operands = 1 : i64, tpu.core_type = #tpu.core_type<tc>, window_params = [{transform_indices = @transform_0, window_bounds = array<i64: 64, 2304>}, {transform_indices = @transform_1, window_bounds = array<i64: 2304, 128>}, {transform_indices = @transform_2, window_bounds = array<i64: 1, 128>}, {transform_indices = @transform_3, window_bounds = array<i64: 1, 128>}, {transform_indices = @transform_4, window_bounds = array<i64: 64, 128>}]} {
    %c0_i32 = arith.constant 0 : i32
    %0 = arith.cmpi eq, %arg2, %c0_i32 : i32
    %1 = arith.extui %0 : i1 to i32
    %c0_i32_0 = arith.constant 0 : i32
    %2 = arith.cmpi ne, %1, %c0_i32_0 : i32
    scf.if %2 {
      %cst_10 = arith.constant 0.000000e+00 : f32
      %12 = vector.broadcast %cst_10 : f32 to vector<64x128xf32>
      %c0_11 = arith.constant 0 : index
      %c0_12 = arith.constant 0 : index
      %13 = vector.load %arg8[%c0_11, %c0_12] : memref<64x128xf32, #tpu.memory_space<vmem>>, vector<64x128xf32>
      tpu.vector_store %arg8[%c0_11, %c0_12], %12 {strides = array<i32>} : memref<64x128xf32, #tpu.memory_space<vmem>>, vector<64x128xf32>,
    } else {
    }
    %c0 = arith.constant 0 : index
    %c0_1 = arith.constant 0 : index
    %3 = vector.load %arg8[%c0, %c0_1] : memref<64x128xf32, #tpu.memory_space<vmem>>, vector<64x128xf32>
    %c0_2 = arith.constant 0 : index
    %c0_3 = arith.constant 0 : index
    %4 = vector.load %arg3[%c0_2, %c0_3] : memref<64x2304xbf16, #tpu.memory_space<vmem>>, vector<64x2304xbf16>
    %c0_4 = arith.constant 0 : index
    %c0_5 = arith.constant 0 : index
    %5 = vector.load %arg4[%c0_4, %c0_5] : memref<2304x128xbf16, #tpu.memory_space<vmem>>, vector<2304x128xbf16>
    %cst = arith.constant dense<0.000000e+00> : vector<64x128xf32>
    %6 = tpu.matmul %4, %5, %cst {dimension_numbers = #tpu.dot_dimension_numbers<[1], [0], [0], [1], [0, 0, 1, 1], [], []>} : vector<64x2304xbf16>, vector<2304x128xbf16>, vector<64x128xf32> -> vector<64x128xf32>
    %7 = arith.addf %3, %6 : vector<64x128xf32>
    %c0_6 = arith.constant 0 : index
    %c0_7 = arith.constant 0 : index
    %8 = vector.load %arg8[%c0_6, %c0_7] : memref<64x128xf32, #tpu.memory_space<vmem>>, vector<64x128xf32>
    tpu.vector_store %arg8[%c0_6, %c0_7], %7 {strides = array<i32>} : memref<64x128xf32, #tpu.memory_space<vmem>>, vector<64x128xf32>,
    %c0_i32_8 = arith.constant 0 : i32
    %9 = arith.cmpi eq, %arg2, %c0_i32_8 : i32
    %10 = arith.extui %9 : i1 to i32
    %c0_i32_9 = arith.constant 0 : i32
    %11 = arith.cmpi ne, %10, %c0_i32_9 : i32
    scf.if %11 {
      %c0_10 = arith.constant 0 : index
      %c0_11 = arith.constant 0 : index
      %12 = vector.load %arg8[%c0_10, %c0_11] : memref<64x128xf32, #tpu.memory_space<vmem>>, vector<64x128xf32>
      %c0_12 = arith.constant 0 : index
      %c0_13 = arith.constant 0 : index
      %13 = vector.load %arg5[%c0_12, %c0_13] : memref<1x128xf32, #tpu.memory_space<vmem>>, vector<1x128xf32>
      %14 = vector.broadcast %13 : vector<1x128xf32> to vector<64x128xf32>
      %15 = arith.mulf %12, %14 : vector<64x128xf32>
      %c0_14 = arith.constant 0 : index
      %c0_15 = arith.constant 0 : index
      %16 = vector.load %arg6[%c0_14, %c0_15] : memref<1x128xf32, #tpu.memory_space<vmem>>, vector<1x128xf32>
      %17 = vector.broadcast %16 : vector<1x128xf32> to vector<64x128xf32>
      %18 = arith.addf %15, %17 : vector<64x128xf32>
      %c0_16 = arith.constant 0 : index
      %c0_17 = arith.constant 0 : index
      %19 = vector.load %arg7[%c0_16, %c0_17] : memref<64x128xf32, #tpu.memory_space<vmem>>, vector<64x128xf32>
      tpu.vector_store %arg7[%c0_16, %c0_17], %18 {strides = array<i32>} : memref<64x128xf32, #tpu.memory_space<vmem>>, vector<64x128xf32>,
    } else {
    }
    return
  }
  func.func @transform_0(%arg0: i32, %arg1: i32, %arg2: i32) -> (i32, i32) {
    %c0_i32 = arith.constant 0 : i32
    return %arg0, %arg2 : i32, i32
  }
  func.func @transform_1(%arg0: i32, %arg1: i32, %arg2: i32) -> (i32, i32) {
    %c0_i32 = arith.constant 0 : i32
    return %arg2, %arg1 : i32, i32
  }
  func.func @transform_2(%arg0: i32, %arg1: i32, %arg2: i32) -> (i32, i32) {
    %c0_i32 = arith.constant 0 : i32
    %c0_i32_0 = arith.constant 0 : i32
    return %c0_i32, %arg1 : i32, i32
  }
  func.func @transform_3(%arg0: i32, %arg1: i32, %arg2: i32) -> (i32, i32) {
    %c0_i32 = arith.constant 0 : i32
    %c0_i32_0 = arith.constant 0 : i32
    return %c0_i32, %arg1 : i32, i32
  }
  func.func @transform_4(%arg0: i32, %arg1: i32, %arg2: i32) -> (i32, i32) {
    %c0_i32 = arith.constant 0 : i32
    return %arg0, %arg1 : i32, i32
  }
}

module attributes {stable_mosaic.version = 11 : i64} {
  func.func @_ca_kernel(%arg0: i32, %arg1: memref<2x64x256xf32, #tpu.memory_space<vmem>>, %arg2: memref<256x16xf32, #tpu.memory_space<vmem>>, %arg3: memref<1x16xf32, #tpu.memory_space<vmem>>, %arg4: memref<16x256xf32, #tpu.memory_space<vmem>>, %arg5: memref<1x256xf32, #tpu.memory_space<vmem>>, %arg6: memref<2x64x256xf32, #tpu.memory_space<vmem>>) attributes {dimension_semantics = [#tpu.dimension_semantics<arbitrary>], iteration_bounds = array<i64: 1>, scalar_prefetch = 0 : i64, scratch_operands = 0 : i64, tpu.core_type = #tpu.core_type<tc>, window_params = [{pipeline_mode = #tpu.pipeline_mode<synchronous>, transform_indices = @transform_0, window_bounds = array<i64: 2, 64, 256>}, {pipeline_mode = #tpu.pipeline_mode<synchronous>, transform_indices = @transform_1, window_bounds = array<i64: 256, 16>}, {pipeline_mode = #tpu.pipeline_mode<synchronous>, transform_indices = @transform_2, window_bounds = array<i64: 1, 16>}, {pipeline_mode = #tpu.pipeline_mode<synchronous>, transform_indices = @transform_3, window_bounds = array<i64: 16, 256>}, {pipeline_mode = #tpu.pipeline_mode<synchronous>, transform_indices = @transform_4, window_bounds = array<i64: 1, 256>}, {pipeline_mode = #tpu.pipeline_mode<synchronous>, transform_indices = @transform_5, window_bounds = array<i64: 2, 64, 256>}]} {
    %c0 = arith.constant 0 : index
    %c0_0 = arith.constant 0 : index
    %c0_1 = arith.constant 0 : index
    %0 = vector.load %arg1[%c0, %c0_0, %c0_1] : memref<2x64x256xf32, #tpu.memory_space<vmem>>, vector<2x64x256xf32>
    %cst = arith.constant dense<0.000000e+00> : vector<2x256xf32>
    %1 = vector.multi_reduction <add>, %0, %cst [1] : vector<2x64x256xf32> to vector<2x256xf32>
    %cst_2 = arith.constant 6.400000e+01 : f32
    %2 = vector.broadcast %cst_2 : f32 to vector<2x256xf32>
    %3 = arith.divf %1, %2 : vector<2x256xf32>
    %c0_3 = arith.constant 0 : index
    %c0_4 = arith.constant 0 : index
    %4 = vector.load %arg2[%c0_3, %c0_4] : memref<256x16xf32, #tpu.memory_space<vmem>>, vector<256x16xf32>
    %cst_5 = arith.constant dense<0.000000e+00> : vector<2x16xf32>
    %5 = tpu.matmul %3, %4, %cst_5 {dimension_numbers = #tpu.dot_dimension_numbers<[1], [0], [0], [1], [0, 0, 1, 1], [], []>} : vector<2x256xf32>, vector<256x16xf32>, vector<2x16xf32> -> vector<2x16xf32>
    %c0_6 = arith.constant 0 : index
    %c0_7 = arith.constant 0 : index
    %6 = vector.load %arg3[%c0_6, %c0_7] : memref<1x16xf32, #tpu.memory_space<vmem>>, vector<1x16xf32>
    %7 = vector.broadcast %6 : vector<1x16xf32> to vector<2x16xf32>
    %8 = arith.addf %5, %7 : vector<2x16xf32>
    %cst_8 = arith.constant 0.000000e+00 : f32
    %9 = vector.broadcast %cst_8 : f32 to vector<2x16xf32>
    %10 = arith.maximumf %8, %9 : vector<2x16xf32>
    %c0_9 = arith.constant 0 : index
    %c0_10 = arith.constant 0 : index
    %11 = vector.load %arg4[%c0_9, %c0_10] : memref<16x256xf32, #tpu.memory_space<vmem>>, vector<16x256xf32>
    %cst_11 = arith.constant dense<0.000000e+00> : vector<2x256xf32>
    %12 = tpu.matmul %10, %11, %cst_11 {dimension_numbers = #tpu.dot_dimension_numbers<[1], [0], [0], [1], [0, 0, 1, 1], [], []>} : vector<2x16xf32>, vector<16x256xf32>, vector<2x256xf32> -> vector<2x256xf32>
    %c0_12 = arith.constant 0 : index
    %c0_13 = arith.constant 0 : index
    %13 = vector.load %arg5[%c0_12, %c0_13] : memref<1x256xf32, #tpu.memory_space<vmem>>, vector<1x256xf32>
    %14 = vector.broadcast %13 : vector<1x256xf32> to vector<2x256xf32>
    %15 = arith.addf %12, %14 : vector<2x256xf32>
    %16 = arith.negf %15 : vector<2x256xf32>
    %17 = math.exp %16 : vector<2x256xf32>
    %cst_14 = arith.constant 1.000000e+00 : f32
    %18 = vector.broadcast %cst_14 : f32 to vector<2x256xf32>
    %19 = arith.addf %18, %17 : vector<2x256xf32>
    %20 = arith.divf %18, %19 : vector<2x256xf32>
    %21 = vector.shape_cast %20 : vector<2x256xf32> to vector<2x1x256xf32>
    %22 = vector.broadcast %21 : vector<2x1x256xf32> to vector<2x64x256xf32>
    %23 = arith.mulf %0, %22 : vector<2x64x256xf32>
    %c0_15 = arith.constant 0 : index
    %c0_16 = arith.constant 0 : index
    %c0_17 = arith.constant 0 : index
    %24 = vector.load %arg6[%c0_15, %c0_16, %c0_17] : memref<2x64x256xf32, #tpu.memory_space<vmem>>, vector<2x64x256xf32>
    tpu.vector_store %arg6[%c0_15, %c0_16, %c0_17], %23 {strides = array<i32>} : memref<2x64x256xf32, #tpu.memory_space<vmem>>, vector<2x64x256xf32>,
    return
  }
  func.func @transform_0(%arg0: i32) -> (i32, i32, i32) {
    %c0_i32 = arith.constant 0 : i32
    %c0_i32_0 = arith.constant 0 : i32
    %c0_i32_1 = arith.constant 0 : i32
    %c0_i32_2 = arith.constant 0 : i32
    return %c0_i32, %c0_i32_0, %c0_i32_1 : i32, i32, i32
  }
  func.func @transform_1(%arg0: i32) -> (i32, i32) {
    %c0_i32 = arith.constant 0 : i32
    %c0_i32_0 = arith.constant 0 : i32
    %c0_i32_1 = arith.constant 0 : i32
    return %c0_i32, %c0_i32_0 : i32, i32
  }
  func.func @transform_2(%arg0: i32) -> (i32, i32) {
    %c0_i32 = arith.constant 0 : i32
    %c0_i32_0 = arith.constant 0 : i32
    %c0_i32_1 = arith.constant 0 : i32
    return %c0_i32, %c0_i32_0 : i32, i32
  }
  func.func @transform_3(%arg0: i32) -> (i32, i32) {
    %c0_i32 = arith.constant 0 : i32
    %c0_i32_0 = arith.constant 0 : i32
    %c0_i32_1 = arith.constant 0 : i32
    return %c0_i32, %c0_i32_0 : i32, i32
  }
  func.func @transform_4(%arg0: i32) -> (i32, i32) {
    %c0_i32 = arith.constant 0 : i32
    %c0_i32_0 = arith.constant 0 : i32
    %c0_i32_1 = arith.constant 0 : i32
    return %c0_i32, %c0_i32_0 : i32, i32
  }
  func.func @transform_5(%arg0: i32) -> (i32, i32, i32) {
    %c0_i32 = arith.constant 0 : i32
    %c0_i32_0 = arith.constant 0 : i32
    %c0_i32_1 = arith.constant 0 : i32
    %c0_i32_2 = arith.constant 0 : i32
    return %c0_i32, %c0_i32_0, %c0_i32_1 : i32, i32, i32
  }
}

module attributes {stable_mosaic.version = 11 : i64} {
  func.func @_mm_kernel(%arg0: i32, %arg1: i32, %arg2: i32, %arg3: memref<64x256xbf16, #tpu.memory_space<vmem>>, %arg4: memref<256x128xbf16, #tpu.memory_space<vmem>>, %arg5: memref<1x128xf32, #tpu.memory_space<vmem>>, %arg6: memref<1x128xf32, #tpu.memory_space<vmem>>, %arg7: memref<64x128xf32, #tpu.memory_space<vmem>>, %arg8: memref<64x128xf32, #tpu.memory_space<vmem>>) attributes {dimension_semantics = [#tpu.dimension_semantics<parallel>, #tpu.dimension_semantics<parallel>, #tpu.dimension_semantics<arbitrary>], iteration_bounds = array<i64: 2, 1, 1>, scalar_prefetch = 0 : i64, scratch_operands = 1 : i64, tpu.core_type = #tpu.core_type<tc>, window_params = [{transform_indices = @transform_0, window_bounds = array<i64: 64, 256>}, {transform_indices = @transform_1, window_bounds = array<i64: 256, 128>}, {transform_indices = @transform_2, window_bounds = array<i64: 1, 128>}, {transform_indices = @transform_3, window_bounds = array<i64: 1, 128>}, {transform_indices = @transform_4, window_bounds = array<i64: 64, 128>}]} {
    %c0_i32 = arith.constant 0 : i32
    %0 = arith.cmpi eq, %arg2, %c0_i32 : i32
    %1 = arith.extui %0 : i1 to i32
    %c0_i32_0 = arith.constant 0 : i32
    %2 = arith.cmpi ne, %1, %c0_i32_0 : i32
    scf.if %2 {
      %cst_10 = arith.constant 0.000000e+00 : f32
      %12 = vector.broadcast %cst_10 : f32 to vector<64x128xf32>
      %c0_11 = arith.constant 0 : index
      %c0_12 = arith.constant 0 : index
      %13 = vector.load %arg8[%c0_11, %c0_12] : memref<64x128xf32, #tpu.memory_space<vmem>>, vector<64x128xf32>
      tpu.vector_store %arg8[%c0_11, %c0_12], %12 {strides = array<i32>} : memref<64x128xf32, #tpu.memory_space<vmem>>, vector<64x128xf32>,
    } else {
    }
    %c0 = arith.constant 0 : index
    %c0_1 = arith.constant 0 : index
    %3 = vector.load %arg8[%c0, %c0_1] : memref<64x128xf32, #tpu.memory_space<vmem>>, vector<64x128xf32>
    %c0_2 = arith.constant 0 : index
    %c0_3 = arith.constant 0 : index
    %4 = vector.load %arg3[%c0_2, %c0_3] : memref<64x256xbf16, #tpu.memory_space<vmem>>, vector<64x256xbf16>
    %c0_4 = arith.constant 0 : index
    %c0_5 = arith.constant 0 : index
    %5 = vector.load %arg4[%c0_4, %c0_5] : memref<256x128xbf16, #tpu.memory_space<vmem>>, vector<256x128xbf16>
    %cst = arith.constant dense<0.000000e+00> : vector<64x128xf32>
    %6 = tpu.matmul %4, %5, %cst {dimension_numbers = #tpu.dot_dimension_numbers<[1], [0], [0], [1], [0, 0, 1, 1], [], []>} : vector<64x256xbf16>, vector<256x128xbf16>, vector<64x128xf32> -> vector<64x128xf32>
    %7 = arith.addf %3, %6 : vector<64x128xf32>
    %c0_6 = arith.constant 0 : index
    %c0_7 = arith.constant 0 : index
    %8 = vector.load %arg8[%c0_6, %c0_7] : memref<64x128xf32, #tpu.memory_space<vmem>>, vector<64x128xf32>
    tpu.vector_store %arg8[%c0_6, %c0_7], %7 {strides = array<i32>} : memref<64x128xf32, #tpu.memory_space<vmem>>, vector<64x128xf32>,
    %c0_i32_8 = arith.constant 0 : i32
    %9 = arith.cmpi eq, %arg2, %c0_i32_8 : i32
    %10 = arith.extui %9 : i1 to i32
    %c0_i32_9 = arith.constant 0 : i32
    %11 = arith.cmpi ne, %10, %c0_i32_9 : i32
    scf.if %11 {
      %c0_10 = arith.constant 0 : index
      %c0_11 = arith.constant 0 : index
      %12 = vector.load %arg8[%c0_10, %c0_11] : memref<64x128xf32, #tpu.memory_space<vmem>>, vector<64x128xf32>
      %c0_12 = arith.constant 0 : index
      %c0_13 = arith.constant 0 : index
      %13 = vector.load %arg5[%c0_12, %c0_13] : memref<1x128xf32, #tpu.memory_space<vmem>>, vector<1x128xf32>
      %14 = vector.broadcast %13 : vector<1x128xf32> to vector<64x128xf32>
      %15 = arith.mulf %12, %14 : vector<64x128xf32>
      %c0_14 = arith.constant 0 : index
      %c0_15 = arith.constant 0 : index
      %16 = vector.load %arg6[%c0_14, %c0_15] : memref<1x128xf32, #tpu.memory_space<vmem>>, vector<1x128xf32>
      %17 = vector.broadcast %16 : vector<1x128xf32> to vector<64x128xf32>
      %18 = arith.addf %15, %17 : vector<64x128xf32>
      %c0_16 = arith.constant 0 : index
      %c0_17 = arith.constant 0 : index
      %19 = vector.load %arg7[%c0_16, %c0_17] : memref<64x128xf32, #tpu.memory_space<vmem>>, vector<64x128xf32>
      tpu.vector_store %arg7[%c0_16, %c0_17], %18 {strides = array<i32>} : memref<64x128xf32, #tpu.memory_space<vmem>>, vector<64x128xf32>,
    } else {
    }
    return
  }
  func.func @transform_0(%arg0: i32, %arg1: i32, %arg2: i32) -> (i32, i32) {
    %c0_i32 = arith.constant 0 : i32
    return %arg0, %arg2 : i32, i32
  }
  func.func @transform_1(%arg0: i32, %arg1: i32, %arg2: i32) -> (i32, i32) {
    %c0_i32 = arith.constant 0 : i32
    return %arg2, %arg1 : i32, i32
  }
  func.func @transform_2(%arg0: i32, %arg1: i32, %arg2: i32) -> (i32, i32) {
    %c0_i32 = arith.constant 0 : i32
    %c0_i32_0 = arith.constant 0 : i32
    return %c0_i32, %arg1 : i32, i32
  }
  func.func @transform_3(%arg0: i32, %arg1: i32, %arg2: i32) -> (i32, i32) {
    %c0_i32 = arith.constant 0 : i32
    %c0_i32_0 = arith.constant 0 : i32
    return %c0_i32, %arg1 : i32, i32
  }
  func.func @transform_4(%arg0: i32, %arg1: i32, %arg2: i32) -> (i32, i32) {
    %c0_i32 = arith.constant 0 : i32
    return %arg0, %arg1 : i32, i32
  }
}

module attributes {stable_mosaic.version = 11 : i64} {
  func.func @_mm_kernel(%arg0: i32, %arg1: i32, %arg2: i32, %arg3: memref<64x1280xbf16, #tpu.memory_space<vmem>>, %arg4: memref<1280x128xbf16, #tpu.memory_space<vmem>>, %arg5: memref<1x128xf32, #tpu.memory_space<vmem>>, %arg6: memref<1x128xf32, #tpu.memory_space<vmem>>, %arg7: memref<64x128xf32, #tpu.memory_space<vmem>>, %arg8: memref<64x128xf32, #tpu.memory_space<vmem>>) attributes {dimension_semantics = [#tpu.dimension_semantics<parallel>, #tpu.dimension_semantics<parallel>, #tpu.dimension_semantics<arbitrary>], iteration_bounds = array<i64: 2, 1, 5>, scalar_prefetch = 0 : i64, scratch_operands = 1 : i64, tpu.core_type = #tpu.core_type<tc>, window_params = [{transform_indices = @transform_0, window_bounds = array<i64: 64, 1280>}, {transform_indices = @transform_1, window_bounds = array<i64: 1280, 128>}, {transform_indices = @transform_2, window_bounds = array<i64: 1, 128>}, {transform_indices = @transform_3, window_bounds = array<i64: 1, 128>}, {transform_indices = @transform_4, window_bounds = array<i64: 64, 128>}]} {
    %c0_i32 = arith.constant 0 : i32
    %0 = arith.cmpi eq, %arg2, %c0_i32 : i32
    %1 = arith.extui %0 : i1 to i32
    %c0_i32_0 = arith.constant 0 : i32
    %2 = arith.cmpi ne, %1, %c0_i32_0 : i32
    scf.if %2 {
      %cst_9 = arith.constant 0.000000e+00 : f32
      %12 = vector.broadcast %cst_9 : f32 to vector<64x128xf32>
      %c0_10 = arith.constant 0 : index
      %c0_11 = arith.constant 0 : index
      %13 = vector.load %arg8[%c0_10, %c0_11] : memref<64x128xf32, #tpu.memory_space<vmem>>, vector<64x128xf32>
      tpu.vector_store %arg8[%c0_10, %c0_11], %12 {strides = array<i32>} : memref<64x128xf32, #tpu.memory_space<vmem>>, vector<64x128xf32>,
    } else {
    }
    %c0 = arith.constant 0 : index
    %c0_1 = arith.constant 0 : index
    %3 = vector.load %arg8[%c0, %c0_1] : memref<64x128xf32, #tpu.memory_space<vmem>>, vector<64x128xf32>
    %c0_2 = arith.constant 0 : index
    %c0_3 = arith.constant 0 : index
    %4 = vector.load %arg3[%c0_2, %c0_3] : memref<64x1280xbf16, #tpu.memory_space<vmem>>, vector<64x1280xbf16>
    %c0_4 = arith.constant 0 : index
    %c0_5 = arith.constant 0 : index
    %5 = vector.load %arg4[%c0_4, %c0_5] : memref<1280x128xbf16, #tpu.memory_space<vmem>>, vector<1280x128xbf16>
    %cst = arith.constant dense<0.000000e+00> : vector<64x128xf32>
    %6 = tpu.matmul %4, %5, %cst {dimension_numbers = #tpu.dot_dimension_numbers<[1], [0], [0], [1], [0, 0, 1, 1], [], []>} : vector<64x1280xbf16>, vector<1280x128xbf16>, vector<64x128xf32> -> vector<64x128xf32>
    %7 = arith.addf %3, %6 : vector<64x128xf32>
    %c0_6 = arith.constant 0 : index
    %c0_7 = arith.constant 0 : index
    %8 = vector.load %arg8[%c0_6, %c0_7] : memref<64x128xf32, #tpu.memory_space<vmem>>, vector<64x128xf32>
    tpu.vector_store %arg8[%c0_6, %c0_7], %7 {strides = array<i32>} : memref<64x128xf32, #tpu.memory_space<vmem>>, vector<64x128xf32>,
    %c4_i32 = arith.constant 4 : i32
    %9 = arith.cmpi eq, %arg2, %c4_i32 : i32
    %10 = arith.extui %9 : i1 to i32
    %c0_i32_8 = arith.constant 0 : i32
    %11 = arith.cmpi ne, %10, %c0_i32_8 : i32
    scf.if %11 {
      %c0_9 = arith.constant 0 : index
      %c0_10 = arith.constant 0 : index
      %12 = vector.load %arg8[%c0_9, %c0_10] : memref<64x128xf32, #tpu.memory_space<vmem>>, vector<64x128xf32>
      %c0_11 = arith.constant 0 : index
      %c0_12 = arith.constant 0 : index
      %13 = vector.load %arg5[%c0_11, %c0_12] : memref<1x128xf32, #tpu.memory_space<vmem>>, vector<1x128xf32>
      %14 = vector.broadcast %13 : vector<1x128xf32> to vector<64x128xf32>
      %15 = arith.mulf %12, %14 : vector<64x128xf32>
      %c0_13 = arith.constant 0 : index
      %c0_14 = arith.constant 0 : index
      %16 = vector.load %arg6[%c0_13, %c0_14] : memref<1x128xf32, #tpu.memory_space<vmem>>, vector<1x128xf32>
      %17 = vector.broadcast %16 : vector<1x128xf32> to vector<64x128xf32>
      %18 = arith.addf %15, %17 : vector<64x128xf32>
      %c0_15 = arith.constant 0 : index
      %c0_16 = arith.constant 0 : index
      %19 = vector.load %arg7[%c0_15, %c0_16] : memref<64x128xf32, #tpu.memory_space<vmem>>, vector<64x128xf32>
      tpu.vector_store %arg7[%c0_15, %c0_16], %18 {strides = array<i32>} : memref<64x128xf32, #tpu.memory_space<vmem>>, vector<64x128xf32>,
    } else {
    }
    return
  }
  func.func @transform_0(%arg0: i32, %arg1: i32, %arg2: i32) -> (i32, i32) {
    %c0_i32 = arith.constant 0 : i32
    return %arg0, %arg2 : i32, i32
  }
  func.func @transform_1(%arg0: i32, %arg1: i32, %arg2: i32) -> (i32, i32) {
    %c0_i32 = arith.constant 0 : i32
    return %arg2, %arg1 : i32, i32
  }
  func.func @transform_2(%arg0: i32, %arg1: i32, %arg2: i32) -> (i32, i32) {
    %c0_i32 = arith.constant 0 : i32
    %c0_i32_0 = arith.constant 0 : i32
    return %c0_i32, %arg1 : i32, i32
  }
  func.func @transform_3(%arg0: i32, %arg1: i32, %arg2: i32) -> (i32, i32) {
    %c0_i32 = arith.constant 0 : i32
    %c0_i32_0 = arith.constant 0 : i32
    return %c0_i32, %arg1 : i32, i32
  }
  func.func @transform_4(%arg0: i32, %arg1: i32, %arg2: i32) -> (i32, i32) {
    %c0_i32 = arith.constant 0 : i32
    return %arg0, %arg1 : i32, i32
  }
}

module attributes {stable_mosaic.version = 11 : i64} {
  func.func @_mm_kernel(%arg0: i32, %arg1: i32, %arg2: i32, %arg3: memref<64x2304xbf16, #tpu.memory_space<vmem>>, %arg4: memref<2304x384xbf16, #tpu.memory_space<vmem>>, %arg5: memref<1x384xf32, #tpu.memory_space<vmem>>, %arg6: memref<1x384xf32, #tpu.memory_space<vmem>>, %arg7: memref<64x384xf32, #tpu.memory_space<vmem>>, %arg8: memref<64x384xf32, #tpu.memory_space<vmem>>) attributes {dimension_semantics = [#tpu.dimension_semantics<parallel>, #tpu.dimension_semantics<parallel>, #tpu.dimension_semantics<arbitrary>], iteration_bounds = array<i64: 2, 1, 3>, scalar_prefetch = 0 : i64, scratch_operands = 1 : i64, tpu.core_type = #tpu.core_type<tc>, window_params = [{transform_indices = @transform_0, window_bounds = array<i64: 64, 2304>}, {transform_indices = @transform_1, window_bounds = array<i64: 2304, 384>}, {transform_indices = @transform_2, window_bounds = array<i64: 1, 384>}, {transform_indices = @transform_3, window_bounds = array<i64: 1, 384>}, {transform_indices = @transform_4, window_bounds = array<i64: 64, 384>}]} {
    %c0_i32 = arith.constant 0 : i32
    %0 = arith.cmpi eq, %arg2, %c0_i32 : i32
    %1 = arith.extui %0 : i1 to i32
    %c0_i32_0 = arith.constant 0 : i32
    %2 = arith.cmpi ne, %1, %c0_i32_0 : i32
    scf.if %2 {
      %cst_9 = arith.constant 0.000000e+00 : f32
      %12 = vector.broadcast %cst_9 : f32 to vector<64x384xf32>
      %c0_10 = arith.constant 0 : index
      %c0_11 = arith.constant 0 : index
      %13 = vector.load %arg8[%c0_10, %c0_11] : memref<64x384xf32, #tpu.memory_space<vmem>>, vector<64x384xf32>
      tpu.vector_store %arg8[%c0_10, %c0_11], %12 {strides = array<i32>} : memref<64x384xf32, #tpu.memory_space<vmem>>, vector<64x384xf32>,
    } else {
    }
    %c0 = arith.constant 0 : index
    %c0_1 = arith.constant 0 : index
    %3 = vector.load %arg8[%c0, %c0_1] : memref<64x384xf32, #tpu.memory_space<vmem>>, vector<64x384xf32>
    %c0_2 = arith.constant 0 : index
    %c0_3 = arith.constant 0 : index
    %4 = vector.load %arg3[%c0_2, %c0_3] : memref<64x2304xbf16, #tpu.memory_space<vmem>>, vector<64x2304xbf16>
    %c0_4 = arith.constant 0 : index
    %c0_5 = arith.constant 0 : index
    %5 = vector.load %arg4[%c0_4, %c0_5] : memref<2304x384xbf16, #tpu.memory_space<vmem>>, vector<2304x384xbf16>
    %cst = arith.constant dense<0.000000e+00> : vector<64x384xf32>
    %6 = tpu.matmul %4, %5, %cst {dimension_numbers = #tpu.dot_dimension_numbers<[1], [0], [0], [1], [0, 0, 1, 1], [], []>} : vector<64x2304xbf16>, vector<2304x384xbf16>, vector<64x384xf32> -> vector<64x384xf32>
    %7 = arith.addf %3, %6 : vector<64x384xf32>
    %c0_6 = arith.constant 0 : index
    %c0_7 = arith.constant 0 : index
    %8 = vector.load %arg8[%c0_6, %c0_7] : memref<64x384xf32, #tpu.memory_space<vmem>>, vector<64x384xf32>
    tpu.vector_store %arg8[%c0_6, %c0_7], %7 {strides = array<i32>} : memref<64x384xf32, #tpu.memory_space<vmem>>, vector<64x384xf32>,
    %c2_i32 = arith.constant 2 : i32
    %9 = arith.cmpi eq, %arg2, %c2_i32 : i32
    %10 = arith.extui %9 : i1 to i32
    %c0_i32_8 = arith.constant 0 : i32
    %11 = arith.cmpi ne, %10, %c0_i32_8 : i32
    scf.if %11 {
      %c0_9 = arith.constant 0 : index
      %c0_10 = arith.constant 0 : index
      %12 = vector.load %arg8[%c0_9, %c0_10] : memref<64x384xf32, #tpu.memory_space<vmem>>, vector<64x384xf32>
      %c0_11 = arith.constant 0 : index
      %c0_12 = arith.constant 0 : index
      %13 = vector.load %arg5[%c0_11, %c0_12] : memref<1x384xf32, #tpu.memory_space<vmem>>, vector<1x384xf32>
      %14 = vector.broadcast %13 : vector<1x384xf32> to vector<64x384xf32>
      %15 = arith.mulf %12, %14 : vector<64x384xf32>
      %c0_13 = arith.constant 0 : index
      %c0_14 = arith.constant 0 : index
      %16 = vector.load %arg6[%c0_13, %c0_14] : memref<1x384xf32, #tpu.memory_space<vmem>>, vector<1x384xf32>
      %17 = vector.broadcast %16 : vector<1x384xf32> to vector<64x384xf32>
      %18 = arith.addf %15, %17 : vector<64x384xf32>
      %cst_15 = arith.constant 0.000000e+00 : f32
      %19 = vector.broadcast %cst_15 : f32 to vector<64x384xf32>
      %20 = arith.maximumf %18, %19 : vector<64x384xf32>
      %c0_16 = arith.constant 0 : index
      %c0_17 = arith.constant 0 : index
      %21 = vector.load %arg7[%c0_16, %c0_17] : memref<64x384xf32, #tpu.memory_space<vmem>>, vector<64x384xf32>
      tpu.vector_store %arg7[%c0_16, %c0_17], %20 {strides = array<i32>} : memref<64x384xf32, #tpu.memory_space<vmem>>, vector<64x384xf32>,
    } else {
    }
    return
  }
  func.func @transform_0(%arg0: i32, %arg1: i32, %arg2: i32) -> (i32, i32) {
    %c0_i32 = arith.constant 0 : i32
    return %arg0, %arg2 : i32, i32
  }
  func.func @transform_1(%arg0: i32, %arg1: i32, %arg2: i32) -> (i32, i32) {
    %c0_i32 = arith.constant 0 : i32
    return %arg2, %arg1 : i32, i32
  }
  func.func @transform_2(%arg0: i32, %arg1: i32, %arg2: i32) -> (i32, i32) {
    %c0_i32 = arith.constant 0 : i32
    %c0_i32_0 = arith.constant 0 : i32
    return %c0_i32, %arg1 : i32, i32
  }
  func.func @transform_3(%arg0: i32, %arg1: i32, %arg2: i32) -> (i32, i32) {
    %c0_i32 = arith.constant 0 : i32
    %c0_i32_0 = arith.constant 0 : i32
    return %c0_i32, %arg1 : i32, i32
  }
  func.func @transform_4(%arg0: i32, %arg1: i32, %arg2: i32) -> (i32, i32) {
    %c0_i32 = arith.constant 0 : i32
    return %arg0, %arg1 : i32, i32
  }
}

module attributes {stable_mosaic.version = 11 : i64} {
  func.func @_mm_kernel(%arg0: i32, %arg1: i32, %arg2: i32, %arg3: memref<128x1152xbf16, #tpu.memory_space<vmem>>, %arg4: memref<1152x512xbf16, #tpu.memory_space<vmem>>, %arg5: memref<1x512xf32, #tpu.memory_space<vmem>>, %arg6: memref<1x512xf32, #tpu.memory_space<vmem>>, %arg7: memref<128x512xf32, #tpu.memory_space<vmem>>, %arg8: memref<128x512xf32, #tpu.memory_space<vmem>>) attributes {dimension_semantics = [#tpu.dimension_semantics<parallel>, #tpu.dimension_semantics<parallel>, #tpu.dimension_semantics<arbitrary>], iteration_bounds = array<i64: 1, 3, 3>, scalar_prefetch = 0 : i64, scratch_operands = 1 : i64, tpu.core_type = #tpu.core_type<tc>, window_params = [{transform_indices = @transform_0, window_bounds = array<i64: 128, 1152>}, {transform_indices = @transform_1, window_bounds = array<i64: 1152, 512>}, {transform_indices = @transform_2, window_bounds = array<i64: 1, 512>}, {transform_indices = @transform_3, window_bounds = array<i64: 1, 512>}, {transform_indices = @transform_4, window_bounds = array<i64: 128, 512>}]} {
    %c0_i32 = arith.constant 0 : i32
    %0 = arith.cmpi eq, %arg2, %c0_i32 : i32
    %1 = arith.extui %0 : i1 to i32
    %c0_i32_0 = arith.constant 0 : i32
    %2 = arith.cmpi ne, %1, %c0_i32_0 : i32
    scf.if %2 {
      %cst_9 = arith.constant 0.000000e+00 : f32
      %12 = vector.broadcast %cst_9 : f32 to vector<128x512xf32>
      %c0_10 = arith.constant 0 : index
      %c0_11 = arith.constant 0 : index
      %13 = vector.load %arg8[%c0_10, %c0_11] : memref<128x512xf32, #tpu.memory_space<vmem>>, vector<128x512xf32>
      tpu.vector_store %arg8[%c0_10, %c0_11], %12 {strides = array<i32>} : memref<128x512xf32, #tpu.memory_space<vmem>>, vector<128x512xf32>,
    } else {
    }
    %c0 = arith.constant 0 : index
    %c0_1 = arith.constant 0 : index
    %3 = vector.load %arg8[%c0, %c0_1] : memref<128x512xf32, #tpu.memory_space<vmem>>, vector<128x512xf32>
    %c0_2 = arith.constant 0 : index
    %c0_3 = arith.constant 0 : index
    %4 = vector.load %arg3[%c0_2, %c0_3] : memref<128x1152xbf16, #tpu.memory_space<vmem>>, vector<128x1152xbf16>
    %c0_4 = arith.constant 0 : index
    %c0_5 = arith.constant 0 : index
    %5 = vector.load %arg4[%c0_4, %c0_5] : memref<1152x512xbf16, #tpu.memory_space<vmem>>, vector<1152x512xbf16>
    %cst = arith.constant dense<0.000000e+00> : vector<128x512xf32>
    %6 = tpu.matmul %4, %5, %cst {dimension_numbers = #tpu.dot_dimension_numbers<[1], [0], [0], [1], [0, 0, 1, 1], [], []>} : vector<128x1152xbf16>, vector<1152x512xbf16>, vector<128x512xf32> -> vector<128x512xf32>
    %7 = arith.addf %3, %6 : vector<128x512xf32>
    %c0_6 = arith.constant 0 : index
    %c0_7 = arith.constant 0 : index
    %8 = vector.load %arg8[%c0_6, %c0_7] : memref<128x512xf32, #tpu.memory_space<vmem>>, vector<128x512xf32>
    tpu.vector_store %arg8[%c0_6, %c0_7], %7 {strides = array<i32>} : memref<128x512xf32, #tpu.memory_space<vmem>>, vector<128x512xf32>,
    %c2_i32 = arith.constant 2 : i32
    %9 = arith.cmpi eq, %arg2, %c2_i32 : i32
    %10 = arith.extui %9 : i1 to i32
    %c0_i32_8 = arith.constant 0 : i32
    %11 = arith.cmpi ne, %10, %c0_i32_8 : i32
    scf.if %11 {
      %c0_9 = arith.constant 0 : index
      %c0_10 = arith.constant 0 : index
      %12 = vector.load %arg8[%c0_9, %c0_10] : memref<128x512xf32, #tpu.memory_space<vmem>>, vector<128x512xf32>
      %c0_11 = arith.constant 0 : index
      %c0_12 = arith.constant 0 : index
      %13 = vector.load %arg5[%c0_11, %c0_12] : memref<1x512xf32, #tpu.memory_space<vmem>>, vector<1x512xf32>
      %14 = vector.broadcast %13 : vector<1x512xf32> to vector<128x512xf32>
      %15 = arith.mulf %12, %14 : vector<128x512xf32>
      %c0_13 = arith.constant 0 : index
      %c0_14 = arith.constant 0 : index
      %16 = vector.load %arg6[%c0_13, %c0_14] : memref<1x512xf32, #tpu.memory_space<vmem>>, vector<1x512xf32>
      %17 = vector.broadcast %16 : vector<1x512xf32> to vector<128x512xf32>
      %18 = arith.addf %15, %17 : vector<128x512xf32>
      %cst_15 = arith.constant 0.000000e+00 : f32
      %19 = vector.broadcast %cst_15 : f32 to vector<128x512xf32>
      %20 = arith.maximumf %18, %19 : vector<128x512xf32>
      %c0_16 = arith.constant 0 : index
      %c0_17 = arith.constant 0 : index
      %21 = vector.load %arg7[%c0_16, %c0_17] : memref<128x512xf32, #tpu.memory_space<vmem>>, vector<128x512xf32>
      tpu.vector_store %arg7[%c0_16, %c0_17], %20 {strides = array<i32>} : memref<128x512xf32, #tpu.memory_space<vmem>>, vector<128x512xf32>,
    } else {
    }
    return
  }
  func.func @transform_0(%arg0: i32, %arg1: i32, %arg2: i32) -> (i32, i32) {
    %c0_i32 = arith.constant 0 : i32
    return %arg0, %arg2 : i32, i32
  }
  func.func @transform_1(%arg0: i32, %arg1: i32, %arg2: i32) -> (i32, i32) {
    %c0_i32 = arith.constant 0 : i32
    return %arg2, %arg1 : i32, i32
  }
  func.func @transform_2(%arg0: i32, %arg1: i32, %arg2: i32) -> (i32, i32) {
    %c0_i32 = arith.constant 0 : i32
    %c0_i32_0 = arith.constant 0 : i32
    return %c0_i32, %arg1 : i32, i32
  }
  func.func @transform_3(%arg0: i32, %arg1: i32, %arg2: i32) -> (i32, i32) {
    %c0_i32 = arith.constant 0 : i32
    %c0_i32_0 = arith.constant 0 : i32
    return %c0_i32, %arg1 : i32, i32
  }
  func.func @transform_4(%arg0: i32, %arg1: i32, %arg2: i32) -> (i32, i32) {
    %c0_i32 = arith.constant 0 : i32
    return %arg0, %arg1 : i32, i32
  }
}

module attributes {stable_mosaic.version = 11 : i64} {
  func.func @_mm_kernel(%arg0: i32, %arg1: i32, %arg2: i32, %arg3: memref<256x1152xbf16, #tpu.memory_space<vmem>>, %arg4: memref<1152x192xbf16, #tpu.memory_space<vmem>>, %arg5: memref<1x192xf32, #tpu.memory_space<vmem>>, %arg6: memref<1x192xf32, #tpu.memory_space<vmem>>, %arg7: memref<256x192xf32, #tpu.memory_space<vmem>>, %arg8: memref<256x192xf32, #tpu.memory_space<vmem>>) attributes {dimension_semantics = [#tpu.dimension_semantics<parallel>, #tpu.dimension_semantics<parallel>, #tpu.dimension_semantics<arbitrary>], iteration_bounds = array<i64: 2, 1, 3>, scalar_prefetch = 0 : i64, scratch_operands = 1 : i64, tpu.core_type = #tpu.core_type<tc>, window_params = [{transform_indices = @transform_0, window_bounds = array<i64: 256, 1152>}, {transform_indices = @transform_1, window_bounds = array<i64: 1152, 192>}, {transform_indices = @transform_2, window_bounds = array<i64: 1, 192>}, {transform_indices = @transform_3, window_bounds = array<i64: 1, 192>}, {transform_indices = @transform_4, window_bounds = array<i64: 256, 192>}]} {
    %c0_i32 = arith.constant 0 : i32
    %0 = arith.cmpi eq, %arg2, %c0_i32 : i32
    %1 = arith.extui %0 : i1 to i32
    %c0_i32_0 = arith.constant 0 : i32
    %2 = arith.cmpi ne, %1, %c0_i32_0 : i32
    scf.if %2 {
      %cst_9 = arith.constant 0.000000e+00 : f32
      %12 = vector.broadcast %cst_9 : f32 to vector<256x192xf32>
      %c0_10 = arith.constant 0 : index
      %c0_11 = arith.constant 0 : index
      %13 = vector.load %arg8[%c0_10, %c0_11] : memref<256x192xf32, #tpu.memory_space<vmem>>, vector<256x192xf32>
      tpu.vector_store %arg8[%c0_10, %c0_11], %12 {strides = array<i32>} : memref<256x192xf32, #tpu.memory_space<vmem>>, vector<256x192xf32>,
    } else {
    }
    %c0 = arith.constant 0 : index
    %c0_1 = arith.constant 0 : index
    %3 = vector.load %arg8[%c0, %c0_1] : memref<256x192xf32, #tpu.memory_space<vmem>>, vector<256x192xf32>
    %c0_2 = arith.constant 0 : index
    %c0_3 = arith.constant 0 : index
    %4 = vector.load %arg3[%c0_2, %c0_3] : memref<256x1152xbf16, #tpu.memory_space<vmem>>, vector<256x1152xbf16>
    %c0_4 = arith.constant 0 : index
    %c0_5 = arith.constant 0 : index
    %5 = vector.load %arg4[%c0_4, %c0_5] : memref<1152x192xbf16, #tpu.memory_space<vmem>>, vector<1152x192xbf16>
    %cst = arith.constant dense<0.000000e+00> : vector<256x192xf32>
    %6 = tpu.matmul %4, %5, %cst {dimension_numbers = #tpu.dot_dimension_numbers<[1], [0], [0], [1], [0, 0, 1, 1], [], []>} : vector<256x1152xbf16>, vector<1152x192xbf16>, vector<256x192xf32> -> vector<256x192xf32>
    %7 = arith.addf %3, %6 : vector<256x192xf32>
    %c0_6 = arith.constant 0 : index
    %c0_7 = arith.constant 0 : index
    %8 = vector.load %arg8[%c0_6, %c0_7] : memref<256x192xf32, #tpu.memory_space<vmem>>, vector<256x192xf32>
    tpu.vector_store %arg8[%c0_6, %c0_7], %7 {strides = array<i32>} : memref<256x192xf32, #tpu.memory_space<vmem>>, vector<256x192xf32>,
    %c2_i32 = arith.constant 2 : i32
    %9 = arith.cmpi eq, %arg2, %c2_i32 : i32
    %10 = arith.extui %9 : i1 to i32
    %c0_i32_8 = arith.constant 0 : i32
    %11 = arith.cmpi ne, %10, %c0_i32_8 : i32
    scf.if %11 {
      %c0_9 = arith.constant 0 : index
      %c0_10 = arith.constant 0 : index
      %12 = vector.load %arg8[%c0_9, %c0_10] : memref<256x192xf32, #tpu.memory_space<vmem>>, vector<256x192xf32>
      %c0_11 = arith.constant 0 : index
      %c0_12 = arith.constant 0 : index
      %13 = vector.load %arg5[%c0_11, %c0_12] : memref<1x192xf32, #tpu.memory_space<vmem>>, vector<1x192xf32>
      %14 = vector.broadcast %13 : vector<1x192xf32> to vector<256x192xf32>
      %15 = arith.mulf %12, %14 : vector<256x192xf32>
      %c0_13 = arith.constant 0 : index
      %c0_14 = arith.constant 0 : index
      %16 = vector.load %arg6[%c0_13, %c0_14] : memref<1x192xf32, #tpu.memory_space<vmem>>, vector<1x192xf32>
      %17 = vector.broadcast %16 : vector<1x192xf32> to vector<256x192xf32>
      %18 = arith.addf %15, %17 : vector<256x192xf32>
      %cst_15 = arith.constant 0.000000e+00 : f32
      %19 = vector.broadcast %cst_15 : f32 to vector<256x192xf32>
      %20 = arith.maximumf %18, %19 : vector<256x192xf32>
      %c0_16 = arith.constant 0 : index
      %c0_17 = arith.constant 0 : index
      %21 = vector.load %arg7[%c0_16, %c0_17] : memref<256x192xf32, #tpu.memory_space<vmem>>, vector<256x192xf32>
      tpu.vector_store %arg7[%c0_16, %c0_17], %20 {strides = array<i32>} : memref<256x192xf32, #tpu.memory_space<vmem>>, vector<256x192xf32>,
    } else {
    }
    return
  }
  func.func @transform_0(%arg0: i32, %arg1: i32, %arg2: i32) -> (i32, i32) {
    %c0_i32 = arith.constant 0 : i32
    return %arg0, %arg2 : i32, i32
  }
  func.func @transform_1(%arg0: i32, %arg1: i32, %arg2: i32) -> (i32, i32) {
    %c0_i32 = arith.constant 0 : i32
    return %arg2, %arg1 : i32, i32
  }
  func.func @transform_2(%arg0: i32, %arg1: i32, %arg2: i32) -> (i32, i32) {
    %c0_i32 = arith.constant 0 : i32
    %c0_i32_0 = arith.constant 0 : i32
    return %c0_i32, %arg1 : i32, i32
  }
  func.func @transform_3(%arg0: i32, %arg1: i32, %arg2: i32) -> (i32, i32) {
    %c0_i32 = arith.constant 0 : i32
    %c0_i32_0 = arith.constant 0 : i32
    return %c0_i32, %arg1 : i32, i32
  }
  func.func @transform_4(%arg0: i32, %arg1: i32, %arg2: i32) -> (i32, i32) {
    %c0_i32 = arith.constant 0 : i32
    return %arg0, %arg1 : i32, i32
  }
}

module attributes {stable_mosaic.version = 11 : i64} {
  func.func @_mm_kernel(%arg0: i32, %arg1: i32, %arg2: i32, %arg3: memref<512x1728xbf16, #tpu.memory_space<vmem>>, %arg4: memref<1728x256xbf16, #tpu.memory_space<vmem>>, %arg5: memref<1x256xf32, #tpu.memory_space<vmem>>, %arg6: memref<1x256xf32, #tpu.memory_space<vmem>>, %arg7: memref<512x256xf32, #tpu.memory_space<vmem>>, %arg8: memref<512x256xf32, #tpu.memory_space<vmem>>) attributes {dimension_semantics = [#tpu.dimension_semantics<parallel>, #tpu.dimension_semantics<parallel>, #tpu.dimension_semantics<arbitrary>], iteration_bounds = array<i64: 1, 3, 1>, scalar_prefetch = 0 : i64, scratch_operands = 1 : i64, tpu.core_type = #tpu.core_type<tc>, window_params = [{transform_indices = @transform_0, window_bounds = array<i64: 512, 1728>}, {transform_indices = @transform_1, window_bounds = array<i64: 1728, 256>}, {transform_indices = @transform_2, window_bounds = array<i64: 1, 256>}, {transform_indices = @transform_3, window_bounds = array<i64: 1, 256>}, {transform_indices = @transform_4, window_bounds = array<i64: 512, 256>}]} {
    %c0_i32 = arith.constant 0 : i32
    %0 = arith.cmpi eq, %arg2, %c0_i32 : i32
    %1 = arith.extui %0 : i1 to i32
    %c0_i32_0 = arith.constant 0 : i32
    %2 = arith.cmpi ne, %1, %c0_i32_0 : i32
    scf.if %2 {
      %cst_10 = arith.constant 0.000000e+00 : f32
      %12 = vector.broadcast %cst_10 : f32 to vector<512x256xf32>
      %c0_11 = arith.constant 0 : index
      %c0_12 = arith.constant 0 : index
      %13 = vector.load %arg8[%c0_11, %c0_12] : memref<512x256xf32, #tpu.memory_space<vmem>>, vector<512x256xf32>
      tpu.vector_store %arg8[%c0_11, %c0_12], %12 {strides = array<i32>} : memref<512x256xf32, #tpu.memory_space<vmem>>, vector<512x256xf32>,
    } else {
    }
    %c0 = arith.constant 0 : index
    %c0_1 = arith.constant 0 : index
    %3 = vector.load %arg8[%c0, %c0_1] : memref<512x256xf32, #tpu.memory_space<vmem>>, vector<512x256xf32>
    %c0_2 = arith.constant 0 : index
    %c0_3 = arith.constant 0 : index
    %4 = vector.load %arg3[%c0_2, %c0_3] : memref<512x1728xbf16, #tpu.memory_space<vmem>>, vector<512x1728xbf16>
    %c0_4 = arith.constant 0 : index
    %c0_5 = arith.constant 0 : index
    %5 = vector.load %arg4[%c0_4, %c0_5] : memref<1728x256xbf16, #tpu.memory_space<vmem>>, vector<1728x256xbf16>
    %cst = arith.constant dense<0.000000e+00> : vector<512x256xf32>
    %6 = tpu.matmul %4, %5, %cst {dimension_numbers = #tpu.dot_dimension_numbers<[1], [0], [0], [1], [0, 0, 1, 1], [], []>} : vector<512x1728xbf16>, vector<1728x256xbf16>, vector<512x256xf32> -> vector<512x256xf32>
    %7 = arith.addf %3, %6 : vector<512x256xf32>
    %c0_6 = arith.constant 0 : index
    %c0_7 = arith.constant 0 : index
    %8 = vector.load %arg8[%c0_6, %c0_7] : memref<512x256xf32, #tpu.memory_space<vmem>>, vector<512x256xf32>
    tpu.vector_store %arg8[%c0_6, %c0_7], %7 {strides = array<i32>} : memref<512x256xf32, #tpu.memory_space<vmem>>, vector<512x256xf32>,
    %c0_i32_8 = arith.constant 0 : i32
    %9 = arith.cmpi eq, %arg2, %c0_i32_8 : i32
    %10 = arith.extui %9 : i1 to i32
    %c0_i32_9 = arith.constant 0 : i32
    %11 = arith.cmpi ne, %10, %c0_i32_9 : i32
    scf.if %11 {
      %c0_10 = arith.constant 0 : index
      %c0_11 = arith.constant 0 : index
      %12 = vector.load %arg8[%c0_10, %c0_11] : memref<512x256xf32, #tpu.memory_space<vmem>>, vector<512x256xf32>
      %c0_12 = arith.constant 0 : index
      %c0_13 = arith.constant 0 : index
      %13 = vector.load %arg5[%c0_12, %c0_13] : memref<1x256xf32, #tpu.memory_space<vmem>>, vector<1x256xf32>
      %14 = vector.broadcast %13 : vector<1x256xf32> to vector<512x256xf32>
      %15 = arith.mulf %12, %14 : vector<512x256xf32>
      %c0_14 = arith.constant 0 : index
      %c0_15 = arith.constant 0 : index
      %16 = vector.load %arg6[%c0_14, %c0_15] : memref<1x256xf32, #tpu.memory_space<vmem>>, vector<1x256xf32>
      %17 = vector.broadcast %16 : vector<1x256xf32> to vector<512x256xf32>
      %18 = arith.addf %15, %17 : vector<512x256xf32>
      %cst_16 = arith.constant 0.000000e+00 : f32
      %19 = vector.broadcast %cst_16 : f32 to vector<512x256xf32>
      %20 = arith.maximumf %18, %19 : vector<512x256xf32>
      %c0_17 = arith.constant 0 : index
      %c0_18 = arith.constant 0 : index
      %21 = vector.load %arg7[%c0_17, %c0_18] : memref<512x256xf32, #tpu.memory_space<vmem>>, vector<512x256xf32>
      tpu.vector_store %arg7[%c0_17, %c0_18], %20 {strides = array<i32>} : memref<512x256xf32, #tpu.memory_space<vmem>>, vector<512x256xf32>,
    } else {
    }
    return
  }
  func.func @transform_0(%arg0: i32, %arg1: i32, %arg2: i32) -> (i32, i32) {
    %c0_i32 = arith.constant 0 : i32
    return %arg0, %arg2 : i32, i32
  }
  func.func @transform_1(%arg0: i32, %arg1: i32, %arg2: i32) -> (i32, i32) {
    %c0_i32 = arith.constant 0 : i32
    return %arg2, %arg1 : i32, i32
  }
  func.func @transform_2(%arg0: i32, %arg1: i32, %arg2: i32) -> (i32, i32) {
    %c0_i32 = arith.constant 0 : i32
    %c0_i32_0 = arith.constant 0 : i32
    return %c0_i32, %arg1 : i32, i32
  }
  func.func @transform_3(%arg0: i32, %arg1: i32, %arg2: i32) -> (i32, i32) {
    %c0_i32 = arith.constant 0 : i32
    %c0_i32_0 = arith.constant 0 : i32
    return %c0_i32, %arg1 : i32, i32
  }
  func.func @transform_4(%arg0: i32, %arg1: i32, %arg2: i32) -> (i32, i32) {
    %c0_i32 = arith.constant 0 : i32
    return %arg0, %arg1 : i32, i32
  }
}

module attributes {stable_mosaic.version = 11 : i64} {
  func.func @_mm_kernel(%arg0: i32, %arg1: i32, %arg2: i32, %arg3: memref<512x1728xbf16, #tpu.memory_space<vmem>>, %arg4: memref<1728x96xbf16, #tpu.memory_space<vmem>>, %arg5: memref<1x96xf32, #tpu.memory_space<vmem>>, %arg6: memref<1x96xf32, #tpu.memory_space<vmem>>, %arg7: memref<512x96xf32, #tpu.memory_space<vmem>>, %arg8: memref<512x96xf32, #tpu.memory_space<vmem>>) attributes {dimension_semantics = [#tpu.dimension_semantics<parallel>, #tpu.dimension_semantics<parallel>, #tpu.dimension_semantics<arbitrary>], iteration_bounds = array<i64: 4, 1, 1>, scalar_prefetch = 0 : i64, scratch_operands = 1 : i64, tpu.core_type = #tpu.core_type<tc>, window_params = [{transform_indices = @transform_0, window_bounds = array<i64: 512, 1728>}, {transform_indices = @transform_1, window_bounds = array<i64: 1728, 96>}, {transform_indices = @transform_2, window_bounds = array<i64: 1, 96>}, {transform_indices = @transform_3, window_bounds = array<i64: 1, 96>}, {transform_indices = @transform_4, window_bounds = array<i64: 512, 96>}]} {
    %c0_i32 = arith.constant 0 : i32
    %0 = arith.cmpi eq, %arg2, %c0_i32 : i32
    %1 = arith.extui %0 : i1 to i32
    %c0_i32_0 = arith.constant 0 : i32
    %2 = arith.cmpi ne, %1, %c0_i32_0 : i32
    scf.if %2 {
      %cst_10 = arith.constant 0.000000e+00 : f32
      %12 = vector.broadcast %cst_10 : f32 to vector<512x96xf32>
      %c0_11 = arith.constant 0 : index
      %c0_12 = arith.constant 0 : index
      %13 = vector.load %arg8[%c0_11, %c0_12] : memref<512x96xf32, #tpu.memory_space<vmem>>, vector<512x96xf32>
      tpu.vector_store %arg8[%c0_11, %c0_12], %12 {strides = array<i32>} : memref<512x96xf32, #tpu.memory_space<vmem>>, vector<512x96xf32>,
    } else {
    }
    %c0 = arith.constant 0 : index
    %c0_1 = arith.constant 0 : index
    %3 = vector.load %arg8[%c0, %c0_1] : memref<512x96xf32, #tpu.memory_space<vmem>>, vector<512x96xf32>
    %c0_2 = arith.constant 0 : index
    %c0_3 = arith.constant 0 : index
    %4 = vector.load %arg3[%c0_2, %c0_3] : memref<512x1728xbf16, #tpu.memory_space<vmem>>, vector<512x1728xbf16>
    %c0_4 = arith.constant 0 : index
    %c0_5 = arith.constant 0 : index
    %5 = vector.load %arg4[%c0_4, %c0_5] : memref<1728x96xbf16, #tpu.memory_space<vmem>>, vector<1728x96xbf16>
    %cst = arith.constant dense<0.000000e+00> : vector<512x96xf32>
    %6 = tpu.matmul %4, %5, %cst {dimension_numbers = #tpu.dot_dimension_numbers<[1], [0], [0], [1], [0, 0, 1, 1], [], []>} : vector<512x1728xbf16>, vector<1728x96xbf16>, vector<512x96xf32> -> vector<512x96xf32>
    %7 = arith.addf %3, %6 : vector<512x96xf32>
    %c0_6 = arith.constant 0 : index
    %c0_7 = arith.constant 0 : index
    %8 = vector.load %arg8[%c0_6, %c0_7] : memref<512x96xf32, #tpu.memory_space<vmem>>, vector<512x96xf32>
    tpu.vector_store %arg8[%c0_6, %c0_7], %7 {strides = array<i32>} : memref<512x96xf32, #tpu.memory_space<vmem>>, vector<512x96xf32>,
    %c0_i32_8 = arith.constant 0 : i32
    %9 = arith.cmpi eq, %arg2, %c0_i32_8 : i32
    %10 = arith.extui %9 : i1 to i32
    %c0_i32_9 = arith.constant 0 : i32
    %11 = arith.cmpi ne, %10, %c0_i32_9 : i32
    scf.if %11 {
      %c0_10 = arith.constant 0 : index
      %c0_11 = arith.constant 0 : index
      %12 = vector.load %arg8[%c0_10, %c0_11] : memref<512x96xf32, #tpu.memory_space<vmem>>, vector<512x96xf32>
      %c0_12 = arith.constant 0 : index
      %c0_13 = arith.constant 0 : index
      %13 = vector.load %arg5[%c0_12, %c0_13] : memref<1x96xf32, #tpu.memory_space<vmem>>, vector<1x96xf32>
      %14 = vector.broadcast %13 : vector<1x96xf32> to vector<512x96xf32>
      %15 = arith.mulf %12, %14 : vector<512x96xf32>
      %c0_14 = arith.constant 0 : index
      %c0_15 = arith.constant 0 : index
      %16 = vector.load %arg6[%c0_14, %c0_15] : memref<1x96xf32, #tpu.memory_space<vmem>>, vector<1x96xf32>
      %17 = vector.broadcast %16 : vector<1x96xf32> to vector<512x96xf32>
      %18 = arith.addf %15, %17 : vector<512x96xf32>
      %cst_16 = arith.constant 0.000000e+00 : f32
      %19 = vector.broadcast %cst_16 : f32 to vector<512x96xf32>
      %20 = arith.maximumf %18, %19 : vector<512x96xf32>
      %c0_17 = arith.constant 0 : index
      %c0_18 = arith.constant 0 : index
      %21 = vector.load %arg7[%c0_17, %c0_18] : memref<512x96xf32, #tpu.memory_space<vmem>>, vector<512x96xf32>
      tpu.vector_store %arg7[%c0_17, %c0_18], %20 {strides = array<i32>} : memref<512x96xf32, #tpu.memory_space<vmem>>, vector<512x96xf32>,
    } else {
    }
    return
  }
  func.func @transform_0(%arg0: i32, %arg1: i32, %arg2: i32) -> (i32, i32) {
    %c0_i32 = arith.constant 0 : i32
    return %arg0, %arg2 : i32, i32
  }
  func.func @transform_1(%arg0: i32, %arg1: i32, %arg2: i32) -> (i32, i32) {
    %c0_i32 = arith.constant 0 : i32
    return %arg2, %arg1 : i32, i32
  }
  func.func @transform_2(%arg0: i32, %arg1: i32, %arg2: i32) -> (i32, i32) {
    %c0_i32 = arith.constant 0 : i32
    %c0_i32_0 = arith.constant 0 : i32
    return %c0_i32, %arg1 : i32, i32
  }
  func.func @transform_3(%arg0: i32, %arg1: i32, %arg2: i32) -> (i32, i32) {
    %c0_i32 = arith.constant 0 : i32
    %c0_i32_0 = arith.constant 0 : i32
    return %c0_i32, %arg1 : i32, i32
  }
  func.func @transform_4(%arg0: i32, %arg1: i32, %arg2: i32) -> (i32, i32) {
    %c0_i32 = arith.constant 0 : i32
    return %arg0, %arg1 : i32, i32
  }
}

module attributes {stable_mosaic.version = 11 : i64} {
  func.func @_mm_kernel(%arg0: i32, %arg1: i32, %arg2: i32, %arg3: memref<512x864xbf16, #tpu.memory_space<vmem>>, %arg4: memref<864x384xbf16, #tpu.memory_space<vmem>>, %arg5: memref<1x384xf32, #tpu.memory_space<vmem>>, %arg6: memref<1x384xf32, #tpu.memory_space<vmem>>, %arg7: memref<512x384xf32, #tpu.memory_space<vmem>>, %arg8: memref<512x384xf32, #tpu.memory_space<vmem>>) attributes {dimension_semantics = [#tpu.dimension_semantics<parallel>, #tpu.dimension_semantics<parallel>, #tpu.dimension_semantics<arbitrary>], iteration_bounds = array<i64: 4, 1, 1>, scalar_prefetch = 0 : i64, scratch_operands = 1 : i64, tpu.core_type = #tpu.core_type<tc>, window_params = [{transform_indices = @transform_0, window_bounds = array<i64: 512, 864>}, {transform_indices = @transform_1, window_bounds = array<i64: 864, 384>}, {transform_indices = @transform_2, window_bounds = array<i64: 1, 384>}, {transform_indices = @transform_3, window_bounds = array<i64: 1, 384>}, {transform_indices = @transform_4, window_bounds = array<i64: 512, 384>}]} {
    %c0_i32 = arith.constant 0 : i32
    %0 = arith.cmpi eq, %arg2, %c0_i32 : i32
    %1 = arith.extui %0 : i1 to i32
    %c0_i32_0 = arith.constant 0 : i32
    %2 = arith.cmpi ne, %1, %c0_i32_0 : i32
    scf.if %2 {
      %cst_10 = arith.constant 0.000000e+00 : f32
      %12 = vector.broadcast %cst_10 : f32 to vector<512x384xf32>
      %c0_11 = arith.constant 0 : index
      %c0_12 = arith.constant 0 : index
      %13 = vector.load %arg8[%c0_11, %c0_12] : memref<512x384xf32, #tpu.memory_space<vmem>>, vector<512x384xf32>
      tpu.vector_store %arg8[%c0_11, %c0_12], %12 {strides = array<i32>} : memref<512x384xf32, #tpu.memory_space<vmem>>, vector<512x384xf32>,
    } else {
    }
    %c0 = arith.constant 0 : index
    %c0_1 = arith.constant 0 : index
    %3 = vector.load %arg8[%c0, %c0_1] : memref<512x384xf32, #tpu.memory_space<vmem>>, vector<512x384xf32>
    %c0_2 = arith.constant 0 : index
    %c0_3 = arith.constant 0 : index
    %4 = vector.load %arg3[%c0_2, %c0_3] : memref<512x864xbf16, #tpu.memory_space<vmem>>, vector<512x864xbf16>
    %c0_4 = arith.constant 0 : index
    %c0_5 = arith.constant 0 : index
    %5 = vector.load %arg4[%c0_4, %c0_5] : memref<864x384xbf16, #tpu.memory_space<vmem>>, vector<864x384xbf16>
    %cst = arith.constant dense<0.000000e+00> : vector<512x384xf32>
    %6 = tpu.matmul %4, %5, %cst {dimension_numbers = #tpu.dot_dimension_numbers<[1], [0], [0], [1], [0, 0, 1, 1], [], []>} : vector<512x864xbf16>, vector<864x384xbf16>, vector<512x384xf32> -> vector<512x384xf32>
    %7 = arith.addf %3, %6 : vector<512x384xf32>
    %c0_6 = arith.constant 0 : index
    %c0_7 = arith.constant 0 : index
    %8 = vector.load %arg8[%c0_6, %c0_7] : memref<512x384xf32, #tpu.memory_space<vmem>>, vector<512x384xf32>
    tpu.vector_store %arg8[%c0_6, %c0_7], %7 {strides = array<i32>} : memref<512x384xf32, #tpu.memory_space<vmem>>, vector<512x384xf32>,
    %c0_i32_8 = arith.constant 0 : i32
    %9 = arith.cmpi eq, %arg2, %c0_i32_8 : i32
    %10 = arith.extui %9 : i1 to i32
    %c0_i32_9 = arith.constant 0 : i32
    %11 = arith.cmpi ne, %10, %c0_i32_9 : i32
    scf.if %11 {
      %c0_10 = arith.constant 0 : index
      %c0_11 = arith.constant 0 : index
      %12 = vector.load %arg8[%c0_10, %c0_11] : memref<512x384xf32, #tpu.memory_space<vmem>>, vector<512x384xf32>
      %c0_12 = arith.constant 0 : index
      %c0_13 = arith.constant 0 : index
      %13 = vector.load %arg5[%c0_12, %c0_13] : memref<1x384xf32, #tpu.memory_space<vmem>>, vector<1x384xf32>
      %14 = vector.broadcast %13 : vector<1x384xf32> to vector<512x384xf32>
      %15 = arith.mulf %12, %14 : vector<512x384xf32>
      %c0_14 = arith.constant 0 : index
      %c0_15 = arith.constant 0 : index
      %16 = vector.load %arg6[%c0_14, %c0_15] : memref<1x384xf32, #tpu.memory_space<vmem>>, vector<1x384xf32>
      %17 = vector.broadcast %16 : vector<1x384xf32> to vector<512x384xf32>
      %18 = arith.addf %15, %17 : vector<512x384xf32>
      %cst_16 = arith.constant 0.000000e+00 : f32
      %19 = vector.broadcast %cst_16 : f32 to vector<512x384xf32>
      %20 = arith.maximumf %18, %19 : vector<512x384xf32>
      %c0_17 = arith.constant 0 : index
      %c0_18 = arith.constant 0 : index
      %21 = vector.load %arg7[%c0_17, %c0_18] : memref<512x384xf32, #tpu.memory_space<vmem>>, vector<512x384xf32>
      tpu.vector_store %arg7[%c0_17, %c0_18], %20 {strides = array<i32>} : memref<512x384xf32, #tpu.memory_space<vmem>>, vector<512x384xf32>,
    } else {
    }
    return
  }
  func.func @transform_0(%arg0: i32, %arg1: i32, %arg2: i32) -> (i32, i32) {
    %c0_i32 = arith.constant 0 : i32
    return %arg0, %arg2 : i32, i32
  }
  func.func @transform_1(%arg0: i32, %arg1: i32, %arg2: i32) -> (i32, i32) {
    %c0_i32 = arith.constant 0 : i32
    return %arg2, %arg1 : i32, i32
  }
  func.func @transform_2(%arg0: i32, %arg1: i32, %arg2: i32) -> (i32, i32) {
    %c0_i32 = arith.constant 0 : i32
    %c0_i32_0 = arith.constant 0 : i32
    return %c0_i32, %arg1 : i32, i32
  }
  func.func @transform_3(%arg0: i32, %arg1: i32, %arg2: i32) -> (i32, i32) {
    %c0_i32 = arith.constant 0 : i32
    %c0_i32_0 = arith.constant 0 : i32
    return %c0_i32, %arg1 : i32, i32
  }
  func.func @transform_4(%arg0: i32, %arg1: i32, %arg2: i32) -> (i32, i32) {
    %c0_i32 = arith.constant 0 : i32
    return %arg0, %arg1 : i32, i32
  }
}

module attributes {stable_mosaic.version = 11 : i64} {
  func.func @_mm_kernel(%arg0: i32, %arg1: i32, %arg2: i32, %arg3: memref<512x864xbf16, #tpu.memory_space<vmem>>, %arg4: memref<864x64xbf16, #tpu.memory_space<vmem>>, %arg5: memref<1x64xf32, #tpu.memory_space<vmem>>, %arg6: memref<1x64xf32, #tpu.memory_space<vmem>>, %arg7: memref<512x64xf32, #tpu.memory_space<vmem>>, %arg8: memref<512x64xf32, #tpu.memory_space<vmem>>) attributes {dimension_semantics = [#tpu.dimension_semantics<parallel>, #tpu.dimension_semantics<parallel>, #tpu.dimension_semantics<arbitrary>], iteration_bounds = array<i64: 16, 1, 1>, scalar_prefetch = 0 : i64, scratch_operands = 1 : i64, tpu.core_type = #tpu.core_type<tc>, window_params = [{transform_indices = @transform_0, window_bounds = array<i64: 512, 864>}, {transform_indices = @transform_1, window_bounds = array<i64: 864, 64>}, {transform_indices = @transform_2, window_bounds = array<i64: 1, 64>}, {transform_indices = @transform_3, window_bounds = array<i64: 1, 64>}, {transform_indices = @transform_4, window_bounds = array<i64: 512, 64>}]} {
    %c0_i32 = arith.constant 0 : i32
    %0 = arith.cmpi eq, %arg2, %c0_i32 : i32
    %1 = arith.extui %0 : i1 to i32
    %c0_i32_0 = arith.constant 0 : i32
    %2 = arith.cmpi ne, %1, %c0_i32_0 : i32
    scf.if %2 {
      %cst_10 = arith.constant 0.000000e+00 : f32
      %12 = vector.broadcast %cst_10 : f32 to vector<512x64xf32>
      %c0_11 = arith.constant 0 : index
      %c0_12 = arith.constant 0 : index
      %13 = vector.load %arg8[%c0_11, %c0_12] : memref<512x64xf32, #tpu.memory_space<vmem>>, vector<512x64xf32>
      tpu.vector_store %arg8[%c0_11, %c0_12], %12 {strides = array<i32>} : memref<512x64xf32, #tpu.memory_space<vmem>>, vector<512x64xf32>,
    } else {
    }
    %c0 = arith.constant 0 : index
    %c0_1 = arith.constant 0 : index
    %3 = vector.load %arg8[%c0, %c0_1] : memref<512x64xf32, #tpu.memory_space<vmem>>, vector<512x64xf32>
    %c0_2 = arith.constant 0 : index
    %c0_3 = arith.constant 0 : index
    %4 = vector.load %arg3[%c0_2, %c0_3] : memref<512x864xbf16, #tpu.memory_space<vmem>>, vector<512x864xbf16>
    %c0_4 = arith.constant 0 : index
    %c0_5 = arith.constant 0 : index
    %5 = vector.load %arg4[%c0_4, %c0_5] : memref<864x64xbf16, #tpu.memory_space<vmem>>, vector<864x64xbf16>
    %cst = arith.constant dense<0.000000e+00> : vector<512x64xf32>
    %6 = tpu.matmul %4, %5, %cst {dimension_numbers = #tpu.dot_dimension_numbers<[1], [0], [0], [1], [0, 0, 1, 1], [], []>} : vector<512x864xbf16>, vector<864x64xbf16>, vector<512x64xf32> -> vector<512x64xf32>
    %7 = arith.addf %3, %6 : vector<512x64xf32>
    %c0_6 = arith.constant 0 : index
    %c0_7 = arith.constant 0 : index
    %8 = vector.load %arg8[%c0_6, %c0_7] : memref<512x64xf32, #tpu.memory_space<vmem>>, vector<512x64xf32>
    tpu.vector_store %arg8[%c0_6, %c0_7], %7 {strides = array<i32>} : memref<512x64xf32, #tpu.memory_space<vmem>>, vector<512x64xf32>,
    %c0_i32_8 = arith.constant 0 : i32
    %9 = arith.cmpi eq, %arg2, %c0_i32_8 : i32
    %10 = arith.extui %9 : i1 to i32
    %c0_i32_9 = arith.constant 0 : i32
    %11 = arith.cmpi ne, %10, %c0_i32_9 : i32
    scf.if %11 {
      %c0_10 = arith.constant 0 : index
      %c0_11 = arith.constant 0 : index
      %12 = vector.load %arg8[%c0_10, %c0_11] : memref<512x64xf32, #tpu.memory_space<vmem>>, vector<512x64xf32>
      %c0_12 = arith.constant 0 : index
      %c0_13 = arith.constant 0 : index
      %13 = vector.load %arg5[%c0_12, %c0_13] : memref<1x64xf32, #tpu.memory_space<vmem>>, vector<1x64xf32>
      %14 = vector.broadcast %13 : vector<1x64xf32> to vector<512x64xf32>
      %15 = arith.mulf %12, %14 : vector<512x64xf32>
      %c0_14 = arith.constant 0 : index
      %c0_15 = arith.constant 0 : index
      %16 = vector.load %arg6[%c0_14, %c0_15] : memref<1x64xf32, #tpu.memory_space<vmem>>, vector<1x64xf32>
      %17 = vector.broadcast %16 : vector<1x64xf32> to vector<512x64xf32>
      %18 = arith.addf %15, %17 : vector<512x64xf32>
      %cst_16 = arith.constant 0.000000e+00 : f32
      %19 = vector.broadcast %cst_16 : f32 to vector<512x64xf32>
      %20 = arith.maximumf %18, %19 : vector<512x64xf32>
      %c0_17 = arith.constant 0 : index
      %c0_18 = arith.constant 0 : index
      %21 = vector.load %arg7[%c0_17, %c0_18] : memref<512x64xf32, #tpu.memory_space<vmem>>, vector<512x64xf32>
      tpu.vector_store %arg7[%c0_17, %c0_18], %20 {strides = array<i32>} : memref<512x64xf32, #tpu.memory_space<vmem>>, vector<512x64xf32>,
    } else {
    }
    return
  }
  func.func @transform_0(%arg0: i32, %arg1: i32, %arg2: i32) -> (i32, i32) {
    %c0_i32 = arith.constant 0 : i32
    return %arg0, %arg2 : i32, i32
  }
  func.func @transform_1(%arg0: i32, %arg1: i32, %arg2: i32) -> (i32, i32) {
    %c0_i32 = arith.constant 0 : i32
    return %arg2, %arg1 : i32, i32
  }
  func.func @transform_2(%arg0: i32, %arg1: i32, %arg2: i32) -> (i32, i32) {
    %c0_i32 = arith.constant 0 : i32
    %c0_i32_0 = arith.constant 0 : i32
    return %c0_i32, %arg1 : i32, i32
  }
  func.func @transform_3(%arg0: i32, %arg1: i32, %arg2: i32) -> (i32, i32) {
    %c0_i32 = arith.constant 0 : i32
    %c0_i32_0 = arith.constant 0 : i32
    return %c0_i32, %arg1 : i32, i32
  }
  func.func @transform_4(%arg0: i32, %arg1: i32, %arg2: i32) -> (i32, i32) {
    %c0_i32 = arith.constant 0 : i32
    return %arg0, %arg1 : i32, i32
  }
}

module attributes {stable_mosaic.version = 11 : i64} {
  func.func @_mm_kernel(%arg0: i32, %arg1: i32, %arg2: i32, %arg3: memref<512x576xbf16, #tpu.memory_space<vmem>>, %arg4: memref<576x128xbf16, #tpu.memory_space<vmem>>, %arg5: memref<1x128xf32, #tpu.memory_space<vmem>>, %arg6: memref<1x128xf32, #tpu.memory_space<vmem>>, %arg7: memref<512x128xf32, #tpu.memory_space<vmem>>, %arg8: memref<512x128xf32, #tpu.memory_space<vmem>>) attributes {dimension_semantics = [#tpu.dimension_semantics<parallel>, #tpu.dimension_semantics<parallel>, #tpu.dimension_semantics<arbitrary>], iteration_bounds = array<i64: 16, 1, 1>, scalar_prefetch = 0 : i64, scratch_operands = 1 : i64, tpu.core_type = #tpu.core_type<tc>, window_params = [{transform_indices = @transform_0, window_bounds = array<i64: 512, 576>}, {transform_indices = @transform_1, window_bounds = array<i64: 576, 128>}, {transform_indices = @transform_2, window_bounds = array<i64: 1, 128>}, {transform_indices = @transform_3, window_bounds = array<i64: 1, 128>}, {transform_indices = @transform_4, window_bounds = array<i64: 512, 128>}]} {
    %c0_i32 = arith.constant 0 : i32
    %0 = arith.cmpi eq, %arg2, %c0_i32 : i32
    %1 = arith.extui %0 : i1 to i32
    %c0_i32_0 = arith.constant 0 : i32
    %2 = arith.cmpi ne, %1, %c0_i32_0 : i32
    scf.if %2 {
      %cst_10 = arith.constant 0.000000e+00 : f32
      %12 = vector.broadcast %cst_10 : f32 to vector<512x128xf32>
      %c0_11 = arith.constant 0 : index
      %c0_12 = arith.constant 0 : index
      %13 = vector.load %arg8[%c0_11, %c0_12] : memref<512x128xf32, #tpu.memory_space<vmem>>, vector<512x128xf32>
      tpu.vector_store %arg8[%c0_11, %c0_12], %12 {strides = array<i32>} : memref<512x128xf32, #tpu.memory_space<vmem>>, vector<512x128xf32>,
    } else {
    }
    %c0 = arith.constant 0 : index
    %c0_1 = arith.constant 0 : index
    %3 = vector.load %arg8[%c0, %c0_1] : memref<512x128xf32, #tpu.memory_space<vmem>>, vector<512x128xf32>
    %c0_2 = arith.constant 0 : index
    %c0_3 = arith.constant 0 : index
    %4 = vector.load %arg3[%c0_2, %c0_3] : memref<512x576xbf16, #tpu.memory_space<vmem>>, vector<512x576xbf16>
    %c0_4 = arith.constant 0 : index
    %c0_5 = arith.constant 0 : index
    %5 = vector.load %arg4[%c0_4, %c0_5] : memref<576x128xbf16, #tpu.memory_space<vmem>>, vector<576x128xbf16>
    %cst = arith.constant dense<0.000000e+00> : vector<512x128xf32>
    %6 = tpu.matmul %4, %5, %cst {dimension_numbers = #tpu.dot_dimension_numbers<[1], [0], [0], [1], [0, 0, 1, 1], [], []>} : vector<512x576xbf16>, vector<576x128xbf16>, vector<512x128xf32> -> vector<512x128xf32>
    %7 = arith.addf %3, %6 : vector<512x128xf32>
    %c0_6 = arith.constant 0 : index
    %c0_7 = arith.constant 0 : index
    %8 = vector.load %arg8[%c0_6, %c0_7] : memref<512x128xf32, #tpu.memory_space<vmem>>, vector<512x128xf32>
    tpu.vector_store %arg8[%c0_6, %c0_7], %7 {strides = array<i32>} : memref<512x128xf32, #tpu.memory_space<vmem>>, vector<512x128xf32>,
    %c0_i32_8 = arith.constant 0 : i32
    %9 = arith.cmpi eq, %arg2, %c0_i32_8 : i32
    %10 = arith.extui %9 : i1 to i32
    %c0_i32_9 = arith.constant 0 : i32
    %11 = arith.cmpi ne, %10, %c0_i32_9 : i32
    scf.if %11 {
      %c0_10 = arith.constant 0 : index
      %c0_11 = arith.constant 0 : index
      %12 = vector.load %arg8[%c0_10, %c0_11] : memref<512x128xf32, #tpu.memory_space<vmem>>, vector<512x128xf32>
      %c0_12 = arith.constant 0 : index
      %c0_13 = arith.constant 0 : index
      %13 = vector.load %arg5[%c0_12, %c0_13] : memref<1x128xf32, #tpu.memory_space<vmem>>, vector<1x128xf32>
      %14 = vector.broadcast %13 : vector<1x128xf32> to vector<512x128xf32>
      %15 = arith.mulf %12, %14 : vector<512x128xf32>
      %c0_14 = arith.constant 0 : index
      %c0_15 = arith.constant 0 : index
      %16 = vector.load %arg6[%c0_14, %c0_15] : memref<1x128xf32, #tpu.memory_space<vmem>>, vector<1x128xf32>
      %17 = vector.broadcast %16 : vector<1x128xf32> to vector<512x128xf32>
      %18 = arith.addf %15, %17 : vector<512x128xf32>
      %19 = math.tanh %18 : vector<512x128xf32>
      %c0_16 = arith.constant 0 : index
      %c0_17 = arith.constant 0 : index
      %20 = vector.load %arg7[%c0_16, %c0_17] : memref<512x128xf32, #tpu.memory_space<vmem>>, vector<512x128xf32>
      tpu.vector_store %arg7[%c0_16, %c0_17], %19 {strides = array<i32>} : memref<512x128xf32, #tpu.memory_space<vmem>>, vector<512x128xf32>,
    } else {
    }
    return
  }
  func.func @transform_0(%arg0: i32, %arg1: i32, %arg2: i32) -> (i32, i32) {
    %c0_i32 = arith.constant 0 : i32
    return %arg0, %arg2 : i32, i32
  }
  func.func @transform_1(%arg0: i32, %arg1: i32, %arg2: i32) -> (i32, i32) {
    %c0_i32 = arith.constant 0 : i32
    return %arg2, %arg1 : i32, i32
  }
  func.func @transform_2(%arg0: i32, %arg1: i32, %arg2: i32) -> (i32, i32) {
    %c0_i32 = arith.constant 0 : i32
    %c0_i32_0 = arith.constant 0 : i32
    return %c0_i32, %arg1 : i32, i32
  }
  func.func @transform_3(%arg0: i32, %arg1: i32, %arg2: i32) -> (i32, i32) {
    %c0_i32 = arith.constant 0 : i32
    %c0_i32_0 = arith.constant 0 : i32
    return %c0_i32, %arg1 : i32, i32
  }
  func.func @transform_4(%arg0: i32, %arg1: i32, %arg2: i32) -> (i32, i32) {
    %c0_i32 = arith.constant 0 : i32
    return %arg0, %arg1 : i32, i32
  }
}

</mosaic_0001>

<bundles_post_ra>
// kernel: tile.43
= control target key start
LH: loop header
LB: loop body
LE: loop exit
PB: predicated region body
PF: predicated region fallthrough
CT: control target
= control target key end

     0   :  { %s34_s0 = inlined_call_operand.vmem [shape: f32[192], index: 0, kind: input, shape index: {}]   ;;  %s35_s1 = inlined_call_operand.vmem [shape: f32[4,192], index: 1, kind: output, shape index: {}]  }
   0x1   :  { %v4_v0 = vld [vmem:[%s34_s0] ss:$0 sm:$0xff]  ;;  %v10_v1 = vld [vmem:[%s34_s0 + $0x1] ss:$0 sm:$0xff] }
   0x2   :  { %5 = vst [vmem:[%s35_s1] sm:$0xf] %v4_v0  ;;  %11 = vst [vmem:[%s35_s1 + $0x4] sm:$0xf] %v10_v1 }

// kernel: tile.48
= control target key start
LH: loop header
LB: loop body
LE: loop exit
PB: predicated region body
PF: predicated region fallthrough
CT: control target
= control target key end

     0   :  { %s21_s10 = smov 3  ;;  %s12_s11 = smov 3  ;;  %vm14_vm0 = vcmask 523264   ;;  %vm32_vm1 = vcmask 1048064   ;;  %s128_s0 = inlined_call_operand.vmem [shape: f32[4,192], index: 0, kind: input, shape index: {}]   ;;  %s129_s1 = inlined_call_operand.vmem [shape: f32[1,768], index: 1, kind: output, shape index: {}]  }
   0x1   :  { %v83_v0 = vld [vmem:[%s128_s0 + $0x4] sm:$0xf]  ;;  %v9_v1 = vld [vmem:[%s128_s0] sm:$0xf]  ;;  %s17_s0 = smov 3  ;;  %s90_s12 = smov 64  }
   0x2   :  { %8 = vst [vmem:[#allocation1 + $0x8] sm:$0xf] %v83_v0  ;;  %10 = vst [vmem:[#allocation1] sm:$0xf] %v9_v1 }
   0x9   :  { %v18_v2 = vld [vmem:[#allocation1] ss:$2 sm:%s17_s0]   ;;  %v22_v3 = vld [vmem:[#allocation1 + $0x3] ss:$-2 sm:%s21_s10]  }
   0xa   :  { %v13_v4 = vld [vmem:[#allocation1 + $0x8] ss:$2 sm:%s12_s11]   ;;  %19 = vst [vmem:[#allocation0] ss:$24 sm:$0x3] %v18_v2  }
   0xb   :  { %v24_v5 = vld.sshfl [vmem:[#allocation1 + $0x1] sm:$0xff pattern:$0xaaaaa802]   ;;  %16 = vst.msk [vmem:[#allocation0 + $0x8] ss:$24 sm:$0x3] %vm14_vm0, %v13_v4  }
   0xc   :  { %v26_v6 = vsel %vm14_vm0, %v24_v5, %v22_v3 }
   0xd   :  { %27 = vrot.lane.b32.xlu0 %v26_v6, %s90_s12 }
  0x11   :  { %v41_v7 = vld [vmem:[#allocation0] sm:$0x1]  ;;  %v59_v8 = vld [vmem:[#allocation0 + $0x18] sm:$0x1] }
  0x12   :  { %44 = vst [vmem:[%s129_s1] sm:$0x1] %v41_v7  ;;  %86 = vst [vmem:[%s129_s1 + $0x3] sm:$0x1] %v59_v8 }
  0x7f   :  { %v28_v9 = vpop.permute.xlu0 %27  }
  0x80   :  { %31 = vst.msk [vmem:[#allocation0 + $0x28] ss:$-24 sm:$0x3] %vm14_vm0, %v28_v9  }
  0x81   :  { %34 = vst.msk [vmem:[#allocation0 + $0x20] ss:$-24 sm:$0x3] %vm32_vm1, %v28_v9   ;;  %36 = vst.msk [vmem:[#allocation0 - $0x20] ss:$24 sm:$0xc] %vm32_vm1, %v28_v9  }
  0x88   :  { %v46_v10 = vld [vmem:[#allocation0 + $0x8] sm:$0x1]  ;;  %v66_v11 = vld [vmem:[#allocation0 + $0x20] sm:$0x1]  ;;  %v52_v12 = vld [vmem:[#allocation0 + $0x10] sm:$0x1] }
  0x89   :  { %84 = vst [vmem:[%s129_s1 + $0x1] sm:$0x1] %v46_v10  ;;  %87 = vst [vmem:[%s129_s1 + $0x4] sm:$0x1] %v66_v11  ;;  %v73_v13 = vld [vmem:[#allocation0 + $0x28] sm:$0x1] }
  0x8a   :  { %85 = vst [vmem:[%s129_s1 + $0x2] sm:$0x1] %v52_v12  ;;  %88 = vst [vmem:[%s129_s1 + $0x5] sm:$0x1] %v73_v13 }

// kernel: tile.53
= control target key start
LH: loop header
LB: loop body
LE: loop exit
PB: predicated region body
PF: predicated region fallthrough
CT: control target
= control target key end

     0   :  { %s22_s0 = inlined_call_operand.vmem [shape: f32[96], index: 0, kind: input, shape index: {}]   ;;  %s23_s1 = inlined_call_operand.vmem [shape: f32[4,96], index: 1, kind: output, shape index: {}]  }
   0x1   :  { %v4_v0 = vld [vmem:[%s22_s0] ss:$0 sm:$0xff] }
   0x2   :  { %5 = vst [vmem:[%s23_s1] sm:$0xf] %v4_v0 }

// kernel: tile.58
= control target key start
LH: loop header
LB: loop body
LE: loop exit
PB: predicated region body
PF: predicated region fallthrough
CT: control target
= control target key end

     0   :  { %vm14_vm0 = vcmask 261120   ;;  %vm18_vm1 = vcmask 523264   ;;  %vm8_vm2 = vcmask 785408   ;;  %s72_s8 = smov 32   ;;  %s73_s9 = smov 64   ;;  %vm21_vm3 = vcmask 1048320   ;;  %s100_s0 = inlined_call_operand.vmem [shape: f32[4,96], index: 0, kind: input, shape index: {}]   ;;  %s101_s1 = inlined_call_operand.vmem [shape: f32[1,384], index: 1, kind: output, shape index: {}]  }
   0x1   :  { %v5_v0 = vld [vmem:[%s100_s0] sm:$0xf]  ;;  %s71_s0 = smov 96   ;;  %vm34_vm4 = vcmask 1048064   ;;  %vm41_vm5 = vcmask 1047808  }
   0x2   :  { %6 = vst [vmem:[#allocation1] sm:$0xf] %v5_v0 }
   0x9   :  { %v11_v1 = vld [vmem:[#allocation1 + $0x1] sm:$0x1]   ;;  %v24_v3 = vld [vmem:[#allocation1 + $0x2] sm:$0x1]   ;;  %v38_v6 = vld [vmem:[#allocation1 + $0x3] sm:$0x1]  }
   0xa   :  { %v13_v2 = vld [vmem:[#allocation1 + $0x1] sm:$0x1]   ;;  %v26_v5 = vld [vmem:[#allocation1 + $0x2] sm:$0x1]   ;;  %v7_v7 = vld [vmem:[#allocation1] sm:$0x1]   ;;  %39 = vrot.lane.b32.xlu1 %v38_v6, %s72_s8 }
   0xb   :  { %v15_v4 = vsel %vm14_vm0, %v13_v2, %v11_v1  ;;  %9 = vst.msk [vmem:[#allocation0] sm:$0x1] %vm8_vm2, %v7_v7   ;;  %v28_v8 = vsel %vm18_vm1, %v26_v5, %v24_v3 }
   0xc   :  { %16 = vrot.lane.b32.xlu0 %v15_v4, %s71_s0 }
  0x10   :  { %29 = vrot.lane.b32.xlu0 %v28_v8, %s73_s9 }
  0x7c   :  { %v40_v10 = vpop.permute.xlu1 %39  }
  0x7e   :  { %v17_v9 = vpop.permute.xlu0 %16  }
  0x7f   :  { %20 = vst.msk [vmem:[#allocation0 + $0x8] sm:$0x1] %vm18_vm1, %v17_v9  }
  0x80   :  { %22 = vst.msk [vmem:[#allocation0] sm:$0x1] %vm21_vm3, %v17_v9  }
  0x82   :  { %v30_v11 = vpop.permute.xlu0 %29  }
  0x83   :  { %33 = vst.msk [vmem:[#allocation0 + $0x10] sm:$0x1] %vm14_vm0, %v30_v11  }
  0x84   :  { %36 = vst.msk [vmem:[#allocation0 + $0x8] sm:$0x1] %vm34_vm4, %v30_v11  }
  0x85   :  { %43 = vst.msk [vmem:[#allocation0 + $0x10] sm:$0x1] %vm41_vm5, %v40_v10  }
  0x87   :  { %v48_v12 = vld [vmem:[#allocation0] sm:$0x1] }
  0x88   :  { %51 = vst [vmem:[%s101_s1] sm:$0x1] %v48_v12 }
  0x8b   :  { %v53_v13 = vld [vmem:[#allocation0 + $0x8] sm:$0x1] }
  0x8c   :  { %66 = vst [vmem:[%s101_s1 + $0x1] sm:$0x1] %v53_v13  ;;  %v59_v14 = vld [vmem:[#allocation0 + $0x10] sm:$0x1] }
  0x8d   :  { %67 = vst [vmem:[%s101_s1 + $0x2] sm:$0x1] %v59_v14 }

</bundles_post_ra>
